<compile_context>
chip_gen: v5e
topology: v5e:2x2
jax: 0.10.0
libtpu: 0.0.40
codegen_flags: <defaults>
</compile_context>

<pallas_src>
import jax
import jax.numpy as jnp
import numpy as np
from jax.experimental import pallas as pl
from jax.experimental.pallas import tpu as pltpu

LEAKY_SLOPE = 0.2


def _gp_kernel(a_ref, s_ref, t_ref, w1t_ref, b1_ref, gram_ref, out_ref):
    # a_ref    : VMEM (1, L)   per-pixel alpha (constant within each sample's P lanes)
    # s_ref    : VMEM (C, L)   student D input slab (L = B*P lanes, sample-major)
    # t_ref    : VMEM (C, L)   teacher D input slab
    # w1t_ref  : VMEM (Hd, C)  W1^T
    # b1_ref   : VMEM (Hd, 1)
    # gram_ref : VMEM (Hd, Hd) (w2s w2s^T) ⊙ (W1^T W1)
    # out_ref  : VMEM (1, L)   per-pixel squared-gradient contribution
    s = s_ref[...]
    t = t_ref[...]
    a = a_ref[...]                                            # (1, L)

    # interpolated = alpha * real(T) + (1 - alpha) * fake(S)  (fused form)
    x = s + a * (t - s)                                       # (C, L)

    # D forward pre-activation (1x1 conv == per-pixel matmul), pixels on lanes
    pre = jnp.dot(w1t_ref[...], x,
                  preferred_element_type=jnp.float32) + b1_ref[...]   # (Hd, L)

    # LeakyReLU'(pre); >= 0 matches jax.grad's convention at exactly 0
    m = jnp.where(pre >= 0.0, 1.0, LEAKY_SLOPE)               # (Hd, L)

    # ||grad_p||^2 = m_p^T [ (w2s w2s^T) ⊙ (W1^T W1) ] m_p  = sum_Hd((G@m) * m)
    q = jnp.dot(gram_ref[...], m, preferred_element_type=jnp.float32)  # (Hd, L)
    out_ref[...] = jnp.sum(q * m, axis=0, keepdims=True)      # (1, L)


def _choose_samples_per_step(N, P):
    # ~64 samples/step (~0.5 MiB per input at C=4, P=256) amortizes per-step
    # overhead and keeps live intermediates (3 x (Hd, B*P) f32) well under the
    # default scoped-VMEM limit on all generations.  Halve for small batches so
    # we (a) don't over-pad and (b) keep >=2 grid steps (v7x has 2 TCs).
    B = 64
    half = max(N // 2, 1)
    while B > 8 and B > half:
        B //= 2
    if (B * P) % 128 != 0:
        # Fall back to one full-width block (lane dim == full dim is always legal).
        B = max(N, 1)
    return B


def criterion_additional_gp(d_in_S, d_in_T, alpha, w1, b1, w2, b2, lambda_gp,
                            samples_per_step=None):
    """d_in_S, d_in_T: (N, C, H, W) float32 (NCHW, like torch). Returns scalar loss."""
    assert d_in_S.shape == d_in_T.shape, \
        "the output dim of D with teacher and student as input differ"
    N, C, H, W = d_in_S.shape
    P = H * W
    Hd = w1.shape[1]

    B = samples_per_step if samples_per_step is not None else _choose_samples_per_step(N, P)
    N_pad = ((N + B - 1) // B) * B
    L = B * P
    num_steps = N_pad // B

    s = d_in_S.reshape(N, C, P).astype(jnp.float32)
    t = d_in_T.reshape(N, C, P).astype(jnp.float32)
    alpha_f = alpha.reshape(N).astype(jnp.float32)
    if N_pad != N:
        s = jnp.pad(s, ((0, N_pad - N), (0, 0), (0, 0)))
        t = jnp.pad(t, ((0, N_pad - N), (0, 0), (0, 0)))
        alpha_f = jnp.pad(alpha_f, (0, N_pad - N))

    # Channels-first flat slabs: (C, N_pad*P), sample-major contiguous P-lane
    # segments.  Host-side transpose/reshape is layout plumbing only.
    s_flat = jnp.transpose(s, (1, 0, 2)).reshape(C, N_pad * P)
    t_flat = jnp.transpose(t, (1, 0, 2)).reshape(C, N_pad * P)
    alpha_row = jnp.repeat(alpha_f, P).reshape(1, N_pad * P)

    # Discriminator parameters (1x1 convs), with sum(W2) folded into the Gram.
    w1f = w1.astype(jnp.float32)                             # (C, Hd)
    w1t = w1f.T                                              # (Hd, C)
    b1col = b1.reshape(Hd, 1).astype(jnp.float32)
    w2s = jnp.sum(w2.astype(jnp.float32), axis=1).reshape(Hd, 1)
    gram_scaled = (w2s @ w2s.T) * (w1t @ w1f)                # (Hd, Hd)
    # NOTE: b2 does not affect the input gradient; kept for API fidelity only.
    # TODO(synk): for production-sized D feature maps (large P*C), tile P on an
    # "arbitrary" reduction axis with a running sum-of-squares accumulator and
    # re-budget VMEM for v7x (64 MiB physical).

    out = pl.pallas_call(
        _gp_kernel,
        out_shape=jax.ShapeDtypeStruct((1, N_pad * P), jnp.float32),
        grid_spec=pltpu.PrefetchScalarGridSpec(
            num_scalar_prefetch=0,
            grid=(num_steps,),
            in_specs=[
                pl.BlockSpec((1, L), lambda i: (0, i)),      # alpha row
                pl.BlockSpec((C, L), lambda i: (0, i)),      # student slab
                pl.BlockSpec((C, L), lambda i: (0, i)),      # teacher slab
                pl.BlockSpec((Hd, C), lambda i: (0, 0)),     # W1^T
                pl.BlockSpec((Hd, 1), lambda i: (0, 0)),     # b1
                pl.BlockSpec((Hd, Hd), lambda i: (0, 0)),    # scaled Gram
            ],
            out_specs=pl.BlockSpec((1, L), lambda i: (0, i)),
        ),
        compiler_params=pltpu.CompilerParams(
            dimension_semantics=("parallel",),               # samples independent
            vmem_limit_bytes=32 * 1024 * 1024),
    )(alpha_row, s_flat, t_flat, w1t, b1col, gram_scaled)

    # Tiny host-side epilogue: per-sample segment sums, sqrt, mean, scale.
    sumsq = jnp.sum(out.reshape(N_pad, P), axis=-1)[:N]      # per-sample ||grad||^2
    grad_l2norm = jnp.sqrt(sumsq)
    d_loss_gp = jnp.mean((grad_l2norm - 1.0) ** 2)
    return lambda_gp * d_loss_gp


# ----------------------------- pure-JAX reference -----------------------------
def _d_net(x_flat, w1, b1, w2, b2):
    h = jax.nn.leaky_relu(x_flat @ w1 + b1, negative_slope=LEAKY_SLOPE)
    return h @ w2 + b2, h


def reference_loss(d_in_S, d_in_T, alpha, w1, b1, w2, b2, lambda_gp):
    N, C, H, W = d_in_S.shape
    P = H * W
    s = jnp.transpose(d_in_S, (0, 2, 3, 1)).reshape(N, P, C)
    t = jnp.transpose(d_in_T, (0, 2, 3, 1)).reshape(N, P, C)
    a = alpha.reshape(N, 1, 1)
    interp = a * t + (1.0 - a) * s

    def scalar_out(x):
        out, _ = _d_net(x, w1, b1, w2, b2)
        return jnp.sum(out)                          # grad_outputs = ones

    grad = jax.grad(scalar_out)(interp)              # (N, P, C)
    g = grad.reshape(N, -1)
    norm = jnp.sqrt(jnp.sum(g * g, axis=1))
    return lambda_gp * jnp.mean((norm - 1.0) ** 2)


if __name__ == "__main__":
    key = jax.random.PRNGKey(0)
    kS, kT, kA, kW1, kB1, kW2 = jax.random.split(key, 6)

    N, C, H, W = 2, 4, 16, 16     # discriminator input (NCHW, like torch)
    Hd, Co = 32, 1                # synthetic D: hidden width 32, 1 output channel
    lambda_gp = 10.0

    d_in_S = jax.random.normal(kS, (N, C, H, W), dtype=jnp.float32)
    d_in_T = jax.random.normal(kT, (N, C, H, W), dtype=jnp.float32)
    # torch.rand(N,1,1,1).expand_as(real)  ->  per-sample uniform alpha
    alpha = jax.random.uniform(kA, (N,), dtype=jnp.float32)

    # deterministic synthetic discriminator parameters (1x1 convs)
    w1 = 0.1 * jax.random.normal(kW1, (C, Hd), dtype=jnp.float32)
    b1 = 0.05 * jax.random.normal(kB1, (Hd,), dtype=jnp.float32)
    w2 = 0.1 * jax.random.normal(kW2, (Hd, Co), dtype=jnp.float32)
    b2 = jnp.zeros((Co,), dtype=jnp.float32)

    loss = criterion_additional_gp(d_in_S, d_in_T, alpha, w1, b1, w2, b2, lambda_gp)
    loss = jax.block_until_ready(loss)

    ref = reference_loss(d_in_S, d_in_T, alpha, w1, b1, w2, b2, lambda_gp)
    np.testing.assert_allclose(np.asarray(loss), np.asarray(ref), rtol=3e-4, atol=1e-5)

    print("KERNEL_OK")
</pallas_src>

<mosaic_0001>
module attributes {stable_mosaic.version = 11 : i64} {
  func.func @_gp_kernel(%arg0: i32, %arg1: memref<1x2048xf32, #tpu.memory_space<vmem>>, %arg2: memref<4x2048xf32, #tpu.memory_space<vmem>>, %arg3: memref<4x2048xf32, #tpu.memory_space<vmem>>, %arg4: memref<32x4xf32, #tpu.memory_space<vmem>>, %arg5: memref<32x1xf32, #tpu.memory_space<vmem>>, %arg6: memref<32x32xf32, #tpu.memory_space<vmem>>, %arg7: memref<1x2048xf32, #tpu.memory_space<vmem>>) attributes {dimension_semantics = [#tpu.dimension_semantics<parallel>], iteration_bounds = array<i64: 1>, scalar_prefetch = 0 : i64, scratch_operands = 0 : i64, tpu.core_type = #tpu.core_type<tc>, window_params = [{transform_indices = @transform_0, window_bounds = array<i64: 1, 2048>}, {transform_indices = @transform_1, window_bounds = array<i64: 4, 2048>}, {transform_indices = @transform_2, window_bounds = array<i64: 4, 2048>}, {pipeline_mode = #tpu.pipeline_mode<synchronous>, transform_indices = @transform_3, window_bounds = array<i64: 32, 4>}, {pipeline_mode = #tpu.pipeline_mode<synchronous>, transform_indices = @transform_4, window_bounds = array<i64: 32, 1>}, {pipeline_mode = #tpu.pipeline_mode<synchronous>, transform_indices = @transform_5, window_bounds = array<i64: 32, 32>}, {transform_indices = @transform_6, window_bounds = array<i64: 1, 2048>}]} {
    %c0 = arith.constant 0 : index
    %c0_0 = arith.constant 0 : index
    %0 = vector.load %arg2[%c0, %c0_0] : memref<4x2048xf32, #tpu.memory_space<vmem>>, vector<4x2048xf32>
    %c0_1 = arith.constant 0 : index
    %c0_2 = arith.constant 0 : index
    %1 = vector.load %arg3[%c0_1, %c0_2] : memref<4x2048xf32, #tpu.memory_space<vmem>>, vector<4x2048xf32>
    %c0_3 = arith.constant 0 : index
    %c0_4 = arith.constant 0 : index
    %2 = vector.load %arg1[%c0_3, %c0_4] : memref<1x2048xf32, #tpu.memory_space<vmem>>, vector<1x2048xf32>
    %3 = arith.subf %1, %0 : vector<4x2048xf32>
    %4 = vector.broadcast %2 : vector<1x2048xf32> to vector<4x2048xf32>
    %5 = arith.mulf %4, %3 : vector<4x2048xf32>
    %6 = arith.addf %0, %5 : vector<4x2048xf32>
    %c0_5 = arith.constant 0 : index
    %c0_6 = arith.constant 0 : index
    %7 = vector.load %arg4[%c0_5, %c0_6] : memref<32x4xf32, #tpu.memory_space<vmem>>, vector<32x4xf32>
    %cst = arith.constant dense<0.000000e+00> : vector<32x2048xf32>
    %8 = tpu.matmul %7, %6, %cst {dimension_numbers = #tpu.dot_dimension_numbers<[1], [0], [0], [1], [0, 0, 1, 1], [], []>} : vector<32x4xf32>, vector<4x2048xf32>, vector<32x2048xf32> -> vector<32x2048xf32>
    %c0_7 = arith.constant 0 : index
    %c0_8 = arith.constant 0 : index
    %9 = vector.load %arg5[%c0_7, %c0_8] : memref<32x1xf32, #tpu.memory_space<vmem>>, vector<32x1xf32>
    %10 = vector.broadcast %9 : vector<32x1xf32> to vector<32x2048xf32>
    %11 = arith.addf %8, %10 : vector<32x2048xf32>
    %cst_9 = arith.constant 0.000000e+00 : f32
    %12 = vector.broadcast %cst_9 : f32 to vector<32x2048xf32>
    %13 = arith.cmpf oge, %11, %12 : vector<32x2048xf32>
    %cst_10 = arith.constant 1.000000e+00 : f32
    %cst_11 = arith.constant 2.000000e-01 : f32
    %14 = vector.broadcast %cst_10 : f32 to vector<32x2048xf32>
    %15 = vector.broadcast %cst_11 : f32 to vector<32x2048xf32>
    %16 = arith.select %13, %14, %15 : vector<32x2048xi1>, vector<32x2048xf32>
    %c0_12 = arith.constant 0 : index
    %c0_13 = arith.constant 0 : index
    %17 = vector.load %arg6[%c0_12, %c0_13] : memref<32x32xf32, #tpu.memory_space<vmem>>, vector<32x32xf32>
    %cst_14 = arith.constant dense<0.000000e+00> : vector<32x2048xf32>
    %18 = tpu.matmul %17, %16, %cst_14 {dimension_numbers = #tpu.dot_dimension_numbers<[1], [0], [0], [1], [0, 0, 1, 1], [], []>} : vector<32x32xf32>, vector<32x2048xf32>, vector<32x2048xf32> -> vector<32x2048xf32>
    %19 = arith.mulf %18, %16 : vector<32x2048xf32>
    %cst_15 = arith.constant dense<0.000000e+00> : vector<2048xf32>
    %20 = vector.multi_reduction <add>, %19, %cst_15 [0] : vector<32x2048xf32> to vector<2048xf32>
    %21 = vector.shape_cast %20 : vector<2048xf32> to vector<1x2048xf32>
    %c0_16 = arith.constant 0 : index
    %c0_17 = arith.constant 0 : index
    %22 = vector.load %arg7[%c0_16, %c0_17] : memref<1x2048xf32, #tpu.memory_space<vmem>>, vector<1x2048xf32>
    tpu.vector_store %arg7[%c0_16, %c0_17], %21 {strides = array<i32>} : memref<1x2048xf32, #tpu.memory_space<vmem>>, vector<1x2048xf32>,
    return
  }
  func.func @transform_0(%arg0: i32) -> (i32, i32) {
    %c0_i32 = arith.constant 0 : i32
    %c0_i32_0 = arith.constant 0 : i32
    return %c0_i32, %arg0 : i32, i32
  }
  func.func @transform_1(%arg0: i32) -> (i32, i32) {
    %c0_i32 = arith.constant 0 : i32
    %c0_i32_0 = arith.constant 0 : i32
    return %c0_i32, %arg0 : i32, i32
  }
  func.func @transform_2(%arg0: i32) -> (i32, i32) {
    %c0_i32 = arith.constant 0 : i32
    %c0_i32_0 = arith.constant 0 : i32
    return %c0_i32, %arg0 : i32, i32
  }
  func.func @transform_3(%arg0: i32) -> (i32, i32) {
    %c0_i32 = arith.constant 0 : i32
    %c0_i32_0 = arith.constant 0 : i32
    %c0_i32_1 = arith.constant 0 : i32
    return %c0_i32, %c0_i32_0 : i32, i32
  }
  func.func @transform_4(%arg0: i32) -> (i32, i32) {
    %c0_i32 = arith.constant 0 : i32
    %c0_i32_0 = arith.constant 0 : i32
    %c0_i32_1 = arith.constant 0 : i32
    return %c0_i32, %c0_i32_0 : i32, i32
  }
  func.func @transform_5(%arg0: i32) -> (i32, i32) {
    %c0_i32 = arith.constant 0 : i32
    %c0_i32_0 = arith.constant 0 : i32
    %c0_i32_1 = arith.constant 0 : i32
    return %c0_i32, %c0_i32_0 : i32, i32
  }
  func.func @transform_6(%arg0: i32) -> (i32, i32) {
    %c0_i32 = arith.constant 0 : i32
    %c0_i32_0 = arith.constant 0 : i32
    return %c0_i32, %arg0 : i32, i32
  }
}

</mosaic_0001>

<bundles_post_ra>
// kernel: tpu_custom_call.1
= control target key start
LH: loop header
LB: loop body
LE: loop exit
PB: predicated region body
PF: predicated region fallthrough
CT: control target
= control target key end

     0   :  { %11 = vsyncpa [#allocation3], 0  ;;  %s2883_s0 = inlined_call_operand.hbm [shape: f32[1,2048], index: 0, kind: input, shape index: {}]   ;;  %s2884_s1 = inlined_call_operand.vmem [shape: f32[4,2048], index: 1, kind: input, shape index: {}]   ;;  %s2885_s2 = inlined_call_operand.hbm [shape: f32[4,2048], index: 2, kind: input, shape index: {}]   ;;  %s2886_s3 = inlined_call_operand.vmem [shape: f32[32,4], index: 3, kind: input, shape index: {}]   ;;  %s2887_s4 = inlined_call_operand.vmem [shape: f32[32,1], index: 4, kind: input, shape index: {}]   ;;  %s2888_s5 = inlined_call_operand.hbm [shape: f32[32,32], index: 5, kind: input, shape index: {}]   ;;  %s2889_s6 = inlined_call_operand.hbm [shape: f32[1,2048], index: 6, kind: output, shape index: {}]  }
   0x1   :  { %12 = vsyncpa [#allocation6], 0  ;;  %s32_s23 = sshll.u32 %s2885_s2, 4  ;;  %s33_s23 = int_to_ptr.hbm [resolvable:$true] %s32_s23 }
   0x2   :  { %13 = vsyncpa [#allocation4], 0  ;;  %s1960_s24 = smov [#allocation5]   ;;  %s19_s28 = sshll.u32 %s2883_s0, 4  ;;  %s20_s28 = int_to_ptr.hbm [resolvable:$true] %s19_s28 }
   0x3   :  { %s34_s25 = sshll.u32 %s1960_s24, 4  ;;  %s1961_s29 = smov [#allocation2]   ;;  %s35_s25 = int_to_ptr.vmem [resolvable:$true] %s34_s25 }
   0x4   :  { %37 = dma.hbm_to_vmem [thread:$0]  %s33_s23, 1024, %s35_s25, [#allocation6]  }
   0x5   :  { %s21_s30 = sshll.u32 %s1961_s29, 4  ;;  %s46_s9 = sshll.u32 %s2888_s5, 4  ;;  %s22_s30 = int_to_ptr.vmem [resolvable:$true] %s21_s30  ;;  %s47_s9 = int_to_ptr.hbm [resolvable:$true] %s46_s9 }
   0x6   :  { %24 = dma.hbm_to_vmem [thread:$0]  %s20_s28, 256, %s22_s30, [#allocation3]  }
   0x7   :  { %s1962_s2 = smov [#allocation7]   ;;  %s1963_s11 = smov 128  }
   0x8   :  { %s48_s10 = sshll.u32 %s1962_s2, 4  ;;  %s1964_s12 = smov 8   ;;  %s49_s10 = int_to_ptr.vmem [resolvable:$true] %s48_s10 }
   0x9   :  { %54 = dma.hbm_to_vmem [thread:$0]  %s47_s9, 512, %s49_s10, [#allocation6], %s1963_s11, %s1963_s11, %s1964_s12  }
   0xa   :  { %1954 = dma.done.wait [#allocation3], 256  }
   0xb   :  { %1955 = vsyncadd [#allocation3], 4294967040 }
   0xc   :  { %1956 = dma.done.wait [#allocation6], 1536  }
   0xd   :  { %1957 = vsyncadd [#allocation6], 4294965760  ;;  %v1965_v0 = vmov 0   ;;  %v67_v1 = vld [vmem:[%s2884_s1] sm:$0xff]  ;;  %v75_v2 = vld [vmem:[#allocation5] sm:$0xff]  ;;  %vm218_vm0 = vcmask 1043456  }
   0xe   :  { %1857 = vset.pattern.permute.xlu1 %v1965_v0  ;;  %1856 = vset.pattern.permute.xlu0 %v1965_v0  ;;  %v85_v3 = vsub.f32 %v75_v2, %v67_v1  ;;  %v2018_v4 = vld [vmem:[%s2884_s1 + $0x8] sm:$0xff]  ;;  %v76_v5 = vld [vmem:[#allocation5 + $0x8] sm:$0xff]  ;;  %v79_v8 = vld [vmem:[#allocation5 + $0x20] sm:$0xff]  ;;  %vm306_vm1 = vcmask 31744   ;;  %vm947_vm10 = vcmask 261120   ;;  %s1693_s17 = sshll.u32 %s2889_s6, 4  ;;  %s1694_s17 = int_to_ptr.hbm [resolvable:$true] %s1693_s17 }
   0xf   :  { %v2023_v6 = vld [vmem:[%s2884_s1 + $0x20] sm:$0xff]  ;;  %v86_v7 = vsub.f32 %v76_v5, %v2018_v4  ;;  %v2026_v9 = vld [vmem:[#allocation2] sm:$0xff]  ;;  %v2031_v10 = vld [vmem:[%s2884_s1 + $0x18] sm:$0xff] }
  0x10   :  { %135 = vst [vmem:[#allocation1] ss:$2 sm:$0xff] %v85_v3  ;;  %v78_v11 = vld [vmem:[#allocation5 + $0x18] sm:$0xff]  ;;  %v77_v13 = vld [vmem:[#allocation5 + $0x10] sm:$0xff]  ;;  %v80_v15 = vld [vmem:[#allocation5 + $0x28] sm:$0xff]  ;;  %v89_v19 = vsub.f32 %v79_v8, %v2023_v6  ;;  %v95_v20 = vperm.slane %v2026_v9, 0 }
  0x11   :  { %137 = vst [vmem:[#allocation1 + $0x10] ss:$2 sm:$0xff] %v86_v7  ;;  %v2036_v12 = vld [vmem:[%s2884_s1 + $0x10] sm:$0xff]  ;;  %v2041_v14 = vld [vmem:[%s2884_s1 + $0x28] sm:$0xff]  ;;  %v88_v17 = vsub.f32 %v78_v11, %v2031_v10  ;;  %v96_v21 = vperm.slane %v2026_v9, 1  ;;  %v97_v23 = vperm.slane %v2026_v9, 2 }
  0x12   :  { %v248_v16 = vld [vmem:[%s2887_s4 + $0x8] sm:$0xff]  ;;  %v87_v18 = vsub.f32 %v77_v13, %v2036_v12  ;;  %v90_v22 = vsub.f32 %v80_v15, %v2041_v14  ;;  %v98_v24 = vperm.slane %v2026_v9, 3  ;;  %v2054_v27 = vld [vmem:[#allocation2 + $0x8] sm:$0xff]  ;;  %v2059_v30 = vld [vmem:[%s2884_s1 + $0x38] sm:$0xff]  ;;  %v102_v38 = vperm.slane %v2026_v9, 7 }
  0x13   :  { %258 = vperm.xlu1 %1857, %v248_v16   ;;  %141 = vst [vmem:[#allocation1 + $0x30] ss:$2 sm:$0xff] %v88_v17  ;;  %v82_v31 = vld [vmem:[#allocation5 + $0x38] sm:$0xff]  ;;  %v103_v39 = vperm.slane %v2054_v27, 0  ;;  %v104_v40 = vperm.slane %v2054_v27, 1  ;;  %v247_v41 = vld [vmem:[%s2887_s4] sm:$0xff] }
  0x14   :  { %139 = vst [vmem:[#allocation1 + $0x20] ss:$2 sm:$0xff] %v87_v18  ;;  %v92_v34 = vsub.f32 %v82_v31, %v2059_v30  ;;  %v101_v42 = vperm.slane %v2026_v9, 6  ;;  %v2072_v43 = vld [vmem:[%s2884_s1 + $0x30] sm:$0xff]  ;;  %v81_v47 = vld [vmem:[#allocation5 + $0x30] sm:$0xff]  ;;  %v100_v48 = vperm.slane %v2026_v9, 5 }
  0x15   :  { %v105_v50 = vperm.slane %v2054_v27, 2  ;;  %v99_v52 = vperm.slane %v2026_v9, 4  ;;  %v106_v53 = vperm.slane %v2054_v27, 3  ;;  %v91_v61 = vsub.f32 %v81_v47, %v2072_v43 }
  0x16   :  { %v109_v15 = vperm.slane %v2054_v27, 6  ;;  %v110_v16 = vperm.slane %v2054_v27, 7 }
  0x17   :  { %v142_v25 = vld.sshfl [vmem:[#allocation1] sm:$0xff pattern:$0x75316420]  ;;  %v143_v26 = vld.sshfl [vmem:[#allocation1 + $0x8] sm:$0xff pattern:$0x75316420] }
  0x18   :  { %150 = vst [vmem:[#allocation1] ss:$2 sm:$0xff] %v89_v19  ;;  %v178_v28 = vmul.f32 %v142_v25, %v95_v20  ;;  %v179_v29 = vmul.f32 %v143_v26, %v96_v21  ;;  %v144_v32 = vld.sshfl [vmem:[#allocation1 + $0x10] sm:$0xff pattern:$0x75316420]  ;;  %v2095_v25 = vld [vmem:[%s2886_s3] sm:$0xff] }
  0x19   :  { %v145_v33 = vld.sshfl [vmem:[#allocation1 + $0x18] sm:$0xff pattern:$0x75316420]  ;;  %v180_v36 = vmul.f32 %v144_v32, %v97_v23 }
  0x1a   :  { %v210_v35 = vrot.slane %v179_v29, 4  ;;  %151 = vst [vmem:[#allocation1 + $0x10] ss:$2 sm:$0xff] %v90_v22  ;;  %v181_v37 = vmul.f32 %v145_v33, %v98_v24  ;;  %v148_v46 = vld.sshfl [vmem:[#allocation1 + $0x30] sm:$0xff pattern:$0x75316420] }
  0x1b   :  { %253 = vperm.xlu1 %1857, %v247_v41   ;;  %v149_v51 = vld.sshfl [vmem:[#allocation1 + $0x38] sm:$0xff pattern:$0x75316420]  ;;  %v184_v55 = vmul.f32 %v148_v46, %v101_v42  ;;  %v147_v57 = vld.sshfl [vmem:[#allocation1 + $0x28] sm:$0xff pattern:$0x75316420] }
  0x1c   :  { %v219_v44 = vsel %vm218_vm0, %v178_v28, %v210_v35  ;;  %v211_v45 = vrot.slane %v181_v37, 4  ;;  %153 = vst [vmem:[#allocation1 + $0x30] ss:$2 sm:$0xff] %v92_v34  ;;  %v185_v56 = vmul.f32 %v149_v51, %v102_v38  ;;  %v183_v2 = vmul.f32 %v147_v57, %v100_v48 }
  0x1d   :  { %v235_v49 = vadd.f32 %v219_v44, %v67_v1  ;;  %v146_v1 = vld.sshfl [vmem:[#allocation1 + $0x20] sm:$0xff pattern:$0x75316420]  ;;  %v107_v33 = vperm.slane %v2054_v27, 4  ;;  %v108_v34 = vperm.slane %v2054_v27, 5 }
  0x1e   :  { %v220_v54 = vsel %vm218_vm0, %v180_v36, %v211_v45  ;;  %v213_v0 = vrot.slane %v185_v56, 4  ;;  %v182_v7 = vmul.f32 %v146_v1, %v99_v52  ;;  %152 = vst [vmem:[#allocation1 + $0x20] ss:$2 sm:$0xff] %v91_v61  ;;  %v212_v20 = vrot.slane %v183_v2, 4  ;;  %v2122_v45 = vld [vmem:[%s2886_s3 + $0x8] sm:$0xff] }
  0x1f   :  { %v154_v58 = vld.sshfl [vmem:[#allocation1] sm:$0xff pattern:$0x75316420]  ;;  %v155_v59 = vld.sshfl [vmem:[#allocation1 + $0x8] sm:$0xff pattern:$0x75316420]  ;;  %v236_v60 = vadd.f32 %v220_v54, %v2018_v4 }
  0x20   :  { %v186_v62 = vmul.f32 %v154_v58, %v103_v39  ;;  %v187_v63 = vmul.f32 %v155_v59, %v104_v40  ;;  %279 = vst [vmem:[#allocation1] ss:$2 sm:$0xff] %v235_v49  ;;  %v222_v13 = vsel %vm218_vm0, %v184_v55, %v213_v0  ;;  %v250_v4 = vld [vmem:[%s2887_s4 + $0x18] sm:$0xff]  ;;  %v221_v28 = vsel %vm218_vm0, %v182_v7, %v212_v20  ;;  %v249_v39 = vld [vmem:[%s2887_s4 + $0x10] sm:$0xff] }
  0x21   :  { %v156_v3 = vld.sshfl [vmem:[#allocation1 + $0x10] sm:$0xff pattern:$0x75316420]  ;;  %v157_v5 = vld.sshfl [vmem:[#allocation1 + $0x18] sm:$0xff pattern:$0x75316420]  ;;  %v238_v17 = vadd.f32 %v222_v13, %v2031_v10  ;;  %268 = vperm.xlu0 %1856, %v250_v4   ;;  %v237_v35 = vadd.f32 %v221_v28, %v2036_v12 }
  0x22   :  { %v214_v8 = vrot.slane %v187_v63, 4  ;;  %v188_v9 = vmul.f32 %v156_v3, %v105_v50  ;;  %v189_v11 = vmul.f32 %v157_v5, %v106_v53  ;;  %281 = vst [vmem:[#allocation1 + $0x10] ss:$2 sm:$0xff] %v236_v60  ;;  %v2141_v50 = vld [vmem:[%s2886_s3 + $0x10] sm:$0xff] }
  0x23   :  { %v160_v22 = vld.sshfl [vmem:[#allocation1 + $0x30] sm:$0xff pattern:$0x75316420]  ;;  %v161_v23 = vld.sshfl [vmem:[#allocation1 + $0x38] sm:$0xff pattern:$0x75316420] }
  0x24   :  { %v223_v18 = vsel %vm218_vm0, %v186_v62, %v214_v8  ;;  %v215_v19 = vrot.slane %v189_v11, 4  ;;  %v192_v26 = vmul.f32 %v160_v22, %v109_v15  ;;  %v193_v10 = vmul.f32 %v161_v23, %v110_v16  ;;  %285 = vst [vmem:[#allocation1 + $0x30] ss:$2 sm:$0xff] %v238_v17 }
  0x25   :  { %v239_v21 = vadd.f32 %v223_v18, %v2023_v6  ;;  %v158_v38 = vld.sshfl [vmem:[#allocation1 + $0x20] sm:$0xff pattern:$0x75316420]  ;;  %v159_v27 = vld.sshfl [vmem:[#allocation1 + $0x28] sm:$0xff pattern:$0x75316420] }
  0x26   :  { %v224_v24 = vsel %vm218_vm0, %v188_v9, %v215_v19  ;;  %v217_v6 = vrot.slane %v193_v10, 4  ;;  %v190_v40 = vmul.f32 %v158_v38, %v107_v33  ;;  %v191_v41 = vmul.f32 %v159_v27, %v108_v34  ;;  %283 = vst [vmem:[#allocation1 + $0x20] ss:$2 sm:$0xff] %v237_v35 }
  0x27   :  { %v286_v29 = vld.sshfl [vmem:[#allocation1] sm:$0xff pattern:$0x75316420]  ;;  %v287_v31 = vld.sshfl [vmem:[#allocation1 + $0x8] sm:$0xff pattern:$0x75316420]  ;;  %v240_v32 = vadd.f32 %v224_v24, %v2041_v14 }
  0x28   :  { %1704 = vmatpush.msk.msra.mxu0 %vm218_vm0, %v286_v29  ;;  %294 = vst [vmem:[#allocation1] ss:$2 sm:$0xff] %v239_v21  ;;  %1709 = vmatpush.msk.msra.mxu1 %vm218_vm0, %v287_v31  ;;  %v226_v14 = vsel %vm218_vm0, %v192_v26, %v217_v6 }
  0x29   :  { %v288_v36 = vld.sshfl [vmem:[#allocation1 + $0x10] sm:$0xff pattern:$0x75316420]  ;;  %v289_v37 = vld.sshfl [vmem:[#allocation1 + $0x18] sm:$0xff pattern:$0x75316420]  ;;  %1705 = vmatmul.msk.f32.vlgmr.msra.gmra.mxu0 %vm306_vm1, %v2095_v25  ;;  %1710 = vmatmul.msk.f32.vlgmr.msra.gmra.mxu1 %vm306_vm1, %v2095_v25  ;;  %v242_v12 = vadd.f32 %v226_v14, %v2059_v30 }
  0x2a   :  { %1714 = vmatpush.msk.msra.mxu2 %vm218_vm0, %v288_v36  ;;  %295 = vst [vmem:[#allocation1 + $0x10] ss:$2 sm:$0xff] %v240_v32  ;;  %1719 = vmatpush.msk.msra.mxu3 %vm218_vm0, %v289_v37  ;;  %v216_v30 = vrot.slane %v191_v41, 4 }
  0x2b   :  { %1715 = vmatmul.msk.f32.vlgmr.msra.gmra.mxu2 %vm306_vm1, %v2095_v25  ;;  %1720 = vmatmul.msk.f32.vlgmr.msra.gmra.mxu3 %vm306_vm1, %v2095_v25  ;;  %v292_v42 = vld.sshfl [vmem:[#allocation1 + $0x30] sm:$0xff pattern:$0x75316420]  ;;  %v293_v44 = vld.sshfl [vmem:[#allocation1 + $0x38] sm:$0xff pattern:$0x75316420] }
  0x2c   :  { %263 = vperm.xlu0 %1856, %v249_v39   ;;  %1734 = vmatpush.msk.msrb.mxu2 %vm218_vm0, %v292_v42  ;;  %297 = vst [vmem:[#allocation1 + $0x30] ss:$2 sm:$0xff] %v242_v12  ;;  %v225_v46 = vsel %vm218_vm0, %v190_v40, %v216_v30 }
  0x2d   :  { %1739 = vmatpush.msk.msrb.mxu3 %vm218_vm0, %v293_v44  ;;  %v241_v47 = vadd.f32 %v225_v46, %v2072_v43  ;;  %v290_v48 = vld.sshfl [vmem:[#allocation1 + $0x20] sm:$0xff pattern:$0x75316420]  ;;  %v291_v49 = vld.sshfl [vmem:[#allocation1 + $0x28] sm:$0xff pattern:$0x75316420] }
  0x2e   :  { %1724 = vmatpush.msk.msrb.mxu0 %vm218_vm0, %v290_v48  ;;  %1729 = vmatpush.msk.msrb.mxu1 %vm218_vm0, %v291_v49  ;;  %v2154_v43 = vld [vmem:[%s2886_s3 + $0x18] sm:$0xff]  ;;  %s1967_s3 = smov [#allocation8]  }
  0x2f   :  { %296 = vst [vmem:[#allocation1 + $0x20] ss:$2 sm:$0xff] %v241_v47  ;;  %v298_v53 = vld.sshfl [vmem:[#allocation1] sm:$0xff pattern:$0x75316420]  ;;  %v2326_v44 = vld [vmem:[#allocation7] sm:$0xff] }
  0x30   :  { %v299_v54 = vld.sshfl [vmem:[#allocation1 + $0x8] sm:$0xff pattern:$0x75316420]  ;;  %1744 = vmatpush.msk.msra.mxu0 %vm218_vm0, %v298_v53  ;;  %s1691_s14 = sshll.u32 %s1967_s3, 4  ;;  %s1692_s14 = int_to_ptr.vmem [resolvable:$true] %s1691_s14 }
  0x31   :  { %1706 = vmatmul.msk.f32.gmra.mxu0 %vm306_vm1, %v2122_v45  ;;  %1711 = vmatmul.msk.f32.gmra.mxu1 %vm306_vm1, %v2122_v45  ;;  %v300_v51 = vld.sshfl [vmem:[#allocation1 + $0x10] sm:$0xff pattern:$0x75316420]  ;;  %v301_v52 = vld.sshfl [vmem:[#allocation1 + $0x18] sm:$0xff pattern:$0x75316420] }
  0x32   :  { %1754 = vmatpush.msk.msra.mxu2 %vm218_vm0, %v300_v51  ;;  %1759 = vmatpush.msk.msra.mxu3 %vm218_vm0, %v301_v52 }
  0x33   :  { %1716 = vmatmul.msk.f32.gmra.mxu2 %vm306_vm1, %v2122_v45  ;;  %1721 = vmatmul.msk.f32.gmra.mxu3 %vm306_vm1, %v2122_v45  ;;  %v304_v55 = vld.sshfl [vmem:[#allocation1 + $0x30] sm:$0xff pattern:$0x75316420]  ;;  %v305_v56 = vld.sshfl [vmem:[#allocation1 + $0x38] sm:$0xff pattern:$0x75316420] }
  0x34   :  { %1749 = vmatpush.msk.msra.mxu1 %vm218_vm0, %v299_v54 }
  0x36   :  { %v302_v57 = vld.sshfl [vmem:[#allocation1 + $0x20] sm:$0xff pattern:$0x75316420]  ;;  %v303_v58 = vld.sshfl [vmem:[#allocation1 + $0x28] sm:$0xff pattern:$0x75316420] }
  0x39   :  { %1707 = vmatmul.msk.f32.gmra.mxu0 %vm306_vm1, %v2141_v50  ;;  %1712 = vmatmul.msk.f32.gmra.mxu1 %vm306_vm1, %v2141_v50 }
  0x3b   :  { %1717 = vmatmul.msk.f32.gmra.mxu2 %vm306_vm1, %v2141_v50  ;;  %1722 = vmatmul.msk.f32.gmra.mxu3 %vm306_vm1, %v2141_v50 }
  0x41   :  { %1708 = vmatmul.msk.f32.gmra.mxu0 %vm306_vm1, %v2154_v43  ;;  %1713 = vmatmul.msk.f32.gmra.mxu1 %vm306_vm1, %v2154_v43 }
  0x43   :  { %1718 = vmatmul.msk.f32.gmra.mxu2 %vm306_vm1, %v2154_v43  ;;  %1723 = vmatmul.msk.f32.gmra.mxu3 %vm306_vm1, %v2154_v43 }
  0x49   :  { %1725 = vmatmul.msk.f32.vlgmr.msrb.gmra.mxu0 %vm306_vm1, %v2095_v25  ;;  %1730 = vmatmul.msk.f32.vlgmr.msrb.gmra.mxu1 %vm306_vm1, %v2095_v25 }
  0x4a   :  { %1764 = vmatpush.msk.msrb.mxu0 %vm218_vm0, %v302_v57  ;;  %1769 = vmatpush.msk.msrb.mxu1 %vm218_vm0, %v303_v58 }
  0x4b   :  { %1735 = vmatmul.msk.f32.vlgmr.msrb.gmra.mxu2 %vm306_vm1, %v2095_v25  ;;  %1740 = vmatmul.msk.f32.vlgmr.msrb.gmra.mxu3 %vm306_vm1, %v2095_v25 }
  0x4c   :  { %1774 = vmatpush.msk.msrb.mxu2 %vm218_vm0, %v304_v55  ;;  %1779 = vmatpush.msk.msrb.mxu3 %vm218_vm0, %v305_v56  ;;  %v2370_v55 = vld [vmem:[#allocation7 + $0x8] sm:$0xff] }
  0x51   :  { %1726 = vmatmul.msk.f32.gmra.mxu0 %vm306_vm1, %v2122_v45  ;;  %1731 = vmatmul.msk.f32.gmra.mxu1 %vm306_vm1, %v2122_v45 }
  0x53   :  { %1736 = vmatmul.msk.f32.gmra.mxu2 %vm306_vm1, %v2122_v45  ;;  %1741 = vmatmul.msk.f32.gmra.mxu3 %vm306_vm1, %v2122_v45 }
  0x59   :  { %1727 = vmatmul.msk.f32.gmra.mxu0 %vm306_vm1, %v2141_v50  ;;  %1732 = vmatmul.msk.f32.gmra.mxu1 %vm306_vm1, %v2141_v50 }
  0x5b   :  { %1737 = vmatmul.msk.f32.gmra.mxu2 %vm306_vm1, %v2141_v50  ;;  %1742 = vmatmul.msk.f32.gmra.mxu3 %vm306_vm1, %v2141_v50 }
  0x61   :  { %1728 = vmatmul.msk.f32.gmra.mxu0 %vm306_vm1, %v2154_v43  ;;  %1733 = vmatmul.msk.f32.gmra.mxu1 %vm306_vm1, %v2154_v43 }
  0x63   :  { %1738 = vmatmul.msk.f32.gmra.mxu2 %vm306_vm1, %v2154_v43  ;;  %1743 = vmatmul.msk.f32.gmra.mxu3 %vm306_vm1, %v2154_v43 }
  0x69   :  { %1745 = vmatmul.msk.f32.vlgmr.msra.gmra.mxu0 %vm306_vm1, %v2095_v25  ;;  %1750 = vmatmul.msk.f32.vlgmr.msra.gmra.mxu1 %vm306_vm1, %v2095_v25 }
  0x6b   :  { %1755 = vmatmul.msk.f32.vlgmr.msra.gmra.mxu2 %vm306_vm1, %v2095_v25  ;;  %1760 = vmatmul.msk.f32.vlgmr.msra.gmra.mxu3 %vm306_vm1, %v2095_v25 }
  0x71   :  { %1746 = vmatmul.msk.f32.gmra.mxu0 %vm306_vm1, %v2122_v45  ;;  %1751 = vmatmul.msk.f32.gmra.mxu1 %vm306_vm1, %v2122_v45 }
  0x73   :  { %1756 = vmatmul.msk.f32.gmra.mxu2 %vm306_vm1, %v2122_v45  ;;  %1761 = vmatmul.msk.f32.gmra.mxu3 %vm306_vm1, %v2122_v45 }
  0x79   :  { %1747 = vmatmul.msk.f32.gmra.mxu0 %vm306_vm1, %v2141_v50  ;;  %1752 = vmatmul.msk.f32.gmra.mxu1 %vm306_vm1, %v2141_v50 }
  0x7b   :  { %1757 = vmatmul.msk.f32.gmra.mxu2 %vm306_vm1, %v2141_v50  ;;  %1762 = vmatmul.msk.f32.gmra.mxu3 %vm306_vm1, %v2141_v50 }
  0x81   :  { %1748 = vmatmul.msk.f32.gmra.mxu0 %vm306_vm1, %v2154_v43  ;;  %1753 = vmatmul.msk.f32.gmra.mxu1 %vm306_vm1, %v2154_v43 }
  0x83   :  { %1758 = vmatmul.msk.f32.gmra.mxu2 %vm306_vm1, %v2154_v43  ;;  %1763 = vmatmul.msk.f32.gmra.mxu3 %vm306_vm1, %v2154_v43 }
  0x85   :  { %v2268_v1 = vpop.permute.xlu1 %258 }
  0x89   :  { %1765 = vmatmul.msk.f32.vlgmr.msrb.gmra.mxu0 %vm306_vm1, %v2095_v25  ;;  %1770 = vmatmul.msk.f32.vlgmr.msrb.gmra.mxu1 %vm306_vm1, %v2095_v25 }
  0x8b   :  { %1775 = vmatmul.msk.f32.vlgmr.msrb.gmra.mxu2 %vm306_vm1, %v2095_v25  ;;  %1780 = vmatmul.msk.f32.vlgmr.msrb.gmra.mxu3 %vm306_vm1, %v2095_v25  ;;  %v2891_v25 = vmov 0.2  }
  0x8d   :  { %v2272_v9 = vpop.permute.xlu1 %253 }
  0x91   :  { %1766 = vmatmul.msk.f32.gmra.mxu0 %vm306_vm1, %v2122_v45  ;;  %1771 = vmatmul.msk.f32.gmra.mxu1 %vm306_vm1, %v2122_v45 }
  0x93   :  { %1776 = vmatmul.msk.f32.gmra.mxu2 %vm306_vm1, %v2122_v45  ;;  %1781 = vmatmul.msk.f32.gmra.mxu3 %vm306_vm1, %v2122_v45  ;;  %v2270_v2 = vpop.permute.xlu0 %268 }
  0x99   :  { %1767 = vmatmul.msk.f32.gmra.mxu0 %vm306_vm1, %v2141_v50  ;;  %1772 = vmatmul.msk.f32.gmra.mxu1 %vm306_vm1, %v2141_v50 }
  0x9b   :  { %1777 = vmatmul.msk.f32.gmra.mxu2 %vm306_vm1, %v2141_v50  ;;  %1782 = vmatmul.msk.f32.gmra.mxu3 %vm306_vm1, %v2141_v50 }
  0x9e   :  { %v2274_v11 = vpop.permute.xlu0 %263 }
  0xa1   :  { %1768 = vmatmul.msk.f32.gmra.mxu0 %vm306_vm1, %v2154_v43  ;;  %1773 = vmatmul.msk.f32.gmra.mxu1 %vm306_vm1, %v2154_v43 }
  0xa3   :  { %1778 = vmatmul.msk.f32.gmra.mxu2 %vm306_vm1, %v2154_v43  ;;  %1783 = vmatmul.msk.f32.gmra.mxu3 %vm306_vm1, %v2154_v43 }
  0xa6   :  { %v368_v59 = vpop.f32.mrf.mxu0  ;;  %v397_v60 = vpop.f32.mrf.mxu1 }
  0xa7   :  { %v369_v13 = vadd.f32 %v368_v59, %v2272_v9  ;;  %v398_v24 = vadd.f32 %v397_v60, %v2272_v9  ;;  %v2380_v60 = vld [vmem:[#allocation7 + $0x10] sm:$0xff] }
  0xa9   :  { %vm815_vm2 = vcmp.ge.f32.partialorder %v369_v13, 0.0  ;;  %vm816_vm9 = vcmp.ge.f32.partialorder %v398_v24, 0.0 }
  0xaa   :  { %v2312_v36 = vsel %vm815_vm2, 1.0, %v2891_v25  ;;  %v2324_v42 = vsel %vm816_vm9, 1.0, %v2891_v25 }
  0xae   :  { %v426_v61 = vpop.f32.mrf.mxu2  ;;  %v455_v62 = vpop.f32.mrf.mxu3 }
  0xaf   :  { %v371_v63 = vpop.f32.mrf.mxu0  ;;  %v400_v0 = vpop.f32.mrf.mxu1  ;;  %v427_v40 = vadd.f32 %v426_v61, %v2272_v9  ;;  %v456_v41 = vadd.f32 %v455_v62, %v2272_v9 }
  0xb0   :  { %v372_v18 = vadd.f32 %v371_v63, %v2268_v1  ;;  %v401_v19 = vadd.f32 %v400_v0, %v2268_v1 }
  0xb1   :  { %vm817_vm2 = vcmp.ge.f32.partialorder %v427_v40, 0.0 }
  0xb2   :  { %vm831_vm7 = vcmp.ge.f32.partialorder %v372_v18, 0.0  ;;  %vm832_vm8 = vcmp.ge.f32.partialorder %v401_v19, 0.0  ;;  %v2363_v53 = vsel %vm817_vm2, 1.0, %v2891_v25 }
  0xb3   :  { %v2304_v34 = vsel %vm831_vm7, 1.0, %v2891_v25  ;;  %v2308_v35 = vsel %vm832_vm8, 1.0, %v2891_v25 }
  0xb6   :  { %v429_v3 = vpop.f32.mrf.mxu2  ;;  %v458_v5 = vpop.f32.mrf.mxu3 }
  0xb7   :  { %v374_v7 = vpop.f32.mrf.mxu0  ;;  %v403_v8 = vpop.f32.mrf.mxu1  ;;  %v430_v37 = vadd.f32 %v429_v3, %v2268_v1  ;;  %v459_v14 = vadd.f32 %v458_v5, %v2268_v1 }
  0xb8   :  { %v375_v16 = vadd.f32 %v374_v7, %v2274_v11  ;;  %v404_v17 = vadd.f32 %v403_v8, %v2274_v11 }
  0xb9   :  { %vm833_vm15 = vcmp.ge.f32.partialorder %v430_v37, 0.0  ;;  %vm834_vm1 = vcmp.ge.f32.partialorder %v459_v14, 0.0 }
  0xba   :  { %vm847_vm5 = vcmp.ge.f32.partialorder %v375_v16, 0.0  ;;  %vm848_vm6 = vcmp.ge.f32.partialorder %v404_v17, 0.0  ;;  %v2355_v50 = vsel %vm833_vm15, 1.0, %v2891_v25  ;;  %v2358_v43 = vsel %vm834_vm1, 1.0, %v2891_v25  ;;  %v2398_v17 = vld [vmem:[#allocation7 + $0x18] sm:$0xff] }
  0xbb   :  { %v2295_v31 = vsel %vm847_vm5, 1.0, %v2891_v25  ;;  %v2298_v32 = vsel %vm848_vm6, 1.0, %v2891_v25 }
  0xbe   :  { %v432_v4 = vpop.f32.mrf.mxu2  ;;  %v461_v15 = vpop.f32.mrf.mxu3 }
  0xbf   :  { %v377_v20 = vpop.f32.mrf.mxu0  ;;  %v406_v21 = vpop.f32.mrf.mxu1  ;;  %v433_v28 = vadd.f32 %v432_v4, %v2274_v11  ;;  %v462_v29 = vadd.f32 %v461_v15, %v2274_v11 }
  0xc0   :  { %v378_v22 = vadd.f32 %v377_v20, %v2270_v2  ;;  %v407_v23 = vadd.f32 %v406_v21, %v2270_v2 }
  0xc1   :  { %vm849_vm11 = vcmp.ge.f32.partialorder %v433_v28, 0.0  ;;  %vm850_vm12 = vcmp.ge.f32.partialorder %v462_v29, 0.0 }
  0xc2   :  { %vm863_vm3 = vcmp.ge.f32.partialorder %v378_v22, 0.0  ;;  %vm864_vm4 = vcmp.ge.f32.partialorder %v407_v23, 0.0  ;;  %v2343_v46 = vsel %vm849_vm11, 1.0, %v2891_v25  ;;  %v2346_v47 = vsel %vm850_vm12, 1.0, %v2891_v25 }
  0xc3   :  { %v2285_v26 = vsel %vm863_vm3, 1.0, %v2891_v25  ;;  %v2288_v10 = vsel %vm864_vm4, 1.0, %v2891_v25  ;;  %vm818_vm3 = vcmp.ge.f32.partialorder %v456_v41, 0.0 }
  0xc4   :  { %972 = vmatpush.msra.mxu0 %v2285_v26  ;;  %1001 = vmatpush.msra.mxu1 %v2288_v10  ;;  %v2366_v54 = vsel %vm818_vm3, 1.0, %v2891_v25 }
  0xc6   :  { %v435_v6 = vpop.f32.mrf.mxu2  ;;  %v464_v33 = vpop.f32.mrf.mxu3  ;;  %973 = vmatpush.msra.mxu0 %v2295_v31  ;;  %1002 = vmatpush.msra.mxu1 %v2298_v32 }
  0xc7   :  { %v436_v38 = vadd.f32 %v435_v6, %v2270_v2  ;;  %v465_v12 = vadd.f32 %v464_v33, %v2270_v2  ;;  %v484_v27 = vpop.f32.mrf.mxu0  ;;  %v513_v39 = vpop.f32.mrf.mxu1 }
  0xc8   :  { %974 = vmatpush.msra.mxu0 %v2304_v34  ;;  %1003 = vmatpush.msra.mxu1 %v2308_v35  ;;  %v485_v7 = vadd.f32 %v484_v27, %v2272_v9  ;;  %v514_v8 = vadd.f32 %v513_v39, %v2272_v9 }
  0xc9   :  { %vm865_vm13 = vcmp.ge.f32.partialorder %v436_v38, 0.0  ;;  %vm866_vm14 = vcmp.ge.f32.partialorder %v465_v12, 0.0 }
  0xca   :  { %v2329_v45 = vsel %vm865_vm13, 1.0, %v2891_v25  ;;  %v2332_v30 = vsel %vm866_vm14, 1.0, %v2891_v25  ;;  %975 = vmatpush.msra.mxu0 %v2312_v36  ;;  %1004 = vmatpush.msra.mxu1 %v2324_v42  ;;  %vm819_vm8 = vcmp.ge.f32.partialorder %v485_v7, 0.0  ;;  %vm820_vm9 = vcmp.ge.f32.partialorder %v514_v8, 0.0 }
  0xcb   :  { %1030 = vmatpush.msra.mxu2 %v2329_v45  ;;  %1059 = vmatpush.msra.mxu3 %v2332_v30  ;;  %v2436_v14 = vsel %vm819_vm8, 1.0, %v2891_v25  ;;  %v2440_v38 = vsel %vm820_vm9, 1.0, %v2891_v25 }
  0xcc   :  { %1784 = vmatmul.msk.f32.vlgmr.msra.gmra.mxu0 %vm947_vm10, %v2326_v44  ;;  %1788 = vmatmul.msk.f32.vlgmr.msra.gmra.mxu1 %vm947_vm10, %v2326_v44 }
  0xcd   :  { %1031 = vmatpush.msra.mxu2 %v2343_v46  ;;  %1060 = vmatpush.msra.mxu3 %v2346_v47 }
  0xce   :  { %v2350_v48 = vpop.f32.mrf.mxu2  ;;  %v2352_v49 = vpop.f32.mrf.mxu3 }
  0xcf   :  { %1032 = vmatpush.msra.mxu2 %v2355_v50  ;;  %1061 = vmatpush.msra.mxu3 %v2358_v43  ;;  %v487_v51 = vpop.f32.mrf.mxu0  ;;  %v516_v52 = vpop.f32.mrf.mxu1  ;;  %v543_v41 = vadd.f32 %v2350_v48, %v2272_v9 }
  0xd0   :  { %v488_v15 = vadd.f32 %v487_v51, %v2268_v1  ;;  %v517_v16 = vadd.f32 %v516_v52, %v2268_v1  ;;  %v572_v51 = vadd.f32 %v2352_v49, %v2272_v9 }
  0xd1   :  { %1033 = vmatpush.msra.mxu2 %v2363_v53  ;;  %1062 = vmatpush.msra.mxu3 %v2366_v54 }
  0xd2   :  { %1792 = vmatmul.msk.f32.vlgmr.msra.gmra.mxu2 %vm947_vm10, %v2326_v44  ;;  %1796 = vmatmul.msk.f32.vlgmr.msra.gmra.mxu3 %vm947_vm10, %v2326_v44  ;;  %vm835_vm11 = vcmp.ge.f32.partialorder %v488_v15, 0.0  ;;  %vm836_vm12 = vcmp.ge.f32.partialorder %v517_v16, 0.0 }
  0xd3   :  { %v2446_v39 = vsel %vm835_vm11, 1.0, %v2891_v25  ;;  %v2450_v40 = vsel %vm836_vm12, 1.0, %v2891_v25 }
  0xd4   :  { %1785 = vmatmul.msk.f32.gmra.mxu0 %vm947_vm10, %v2370_v55  ;;  %1789 = vmatmul.msk.f32.gmra.mxu1 %vm947_vm10, %v2370_v55 }
  0xd6   :  { %v545_v56 = vpop.f32.mrf.mxu2  ;;  %v574_v57 = vpop.f32.mrf.mxu3 }
  0xd7   :  { %v490_v58 = vpop.f32.mrf.mxu0  ;;  %v519_v59 = vpop.f32.mrf.mxu1  ;;  %v546_v12 = vadd.f32 %v545_v56, %v2268_v1  ;;  %v575_v27 = vadd.f32 %v574_v57, %v2268_v1 }
  0xd8   :  { %v491_v63 = vadd.f32 %v490_v58, %v2274_v11  ;;  %v520_v0 = vadd.f32 %v519_v59, %v2274_v11 }
  0xd9   :  { %vm837_vm2 = vcmp.ge.f32.partialorder %v546_v12, 0.0  ;;  %vm838_vm3 = vcmp.ge.f32.partialorder %v575_v27, 0.0 }
  0xda   :  { %1793 = vmatmul.msk.f32.gmra.mxu2 %vm947_vm10, %v2370_v55  ;;  %1797 = vmatmul.msk.f32.gmra.mxu3 %vm947_vm10, %v2370_v55  ;;  %vm851_vm6 = vcmp.ge.f32.partialorder %v491_v63, 0.0  ;;  %vm852_vm7 = vcmp.ge.f32.partialorder %v520_v0, 0.0  ;;  %v2489_v59 = vsel %vm837_vm2, 1.0, %v2891_v25 }
  0xdb   :  { %v2420_v24 = vsel %vm851_vm6, 1.0, %v2891_v25  ;;  %v2424_v28 = vsel %vm852_vm7, 1.0, %v2891_v25 }
  0xdc   :  { %1786 = vmatmul.msk.f32.gmra.mxu0 %vm947_vm10, %v2380_v60  ;;  %1790 = vmatmul.msk.f32.gmra.mxu1 %vm947_vm10, %v2380_v60 }
  0xde   :  { %v548_v61 = vpop.f32.mrf.mxu2  ;;  %v577_v62 = vpop.f32.mrf.mxu3 }
  0xdf   :  { %v493_v3 = vpop.f32.mrf.mxu0  ;;  %v522_v5 = vpop.f32.mrf.mxu1  ;;  %v549_v20 = vadd.f32 %v548_v61, %v2274_v11  ;;  %v578_v21 = vadd.f32 %v577_v62, %v2274_v11  ;;  %v2492_v61 = vsel %vm838_vm3, 1.0, %v2891_v25 }
  0xe0   :  { %v494_v13 = vadd.f32 %v493_v3, %v2270_v2  ;;  %v523_v4 = vadd.f32 %v522_v5, %v2270_v2 }
  0xe1   :  { %vm853_vm15 = vcmp.ge.f32.partialorder %v549_v20, 0.0  ;;  %vm854_vm1 = vcmp.ge.f32.partialorder %v578_v21, 0.0 }
  0xe2   :  { %vm867_vm4 = vcmp.ge.f32.partialorder %v494_v13, 0.0  ;;  %vm868_vm5 = vcmp.ge.f32.partialorder %v523_v4, 0.0  ;;  %1794 = vmatmul.msk.f32.gmra.mxu2 %vm947_vm10, %v2380_v60  ;;  %1798 = vmatmul.msk.f32.gmra.mxu3 %vm947_vm10, %v2380_v60  ;;  %v2477_v48 = vsel %vm853_vm15, 1.0, %v2891_v25  ;;  %v2480_v49 = vsel %vm854_vm1, 1.0, %v2891_v25 }
  0xe3   :  { %v2405_v18 = vsel %vm867_vm4, 1.0, %v2891_v25  ;;  %v2408_v19 = vsel %vm868_vm5, 1.0, %v2891_v25  ;;  %vm821_vm4 = vcmp.ge.f32.partialorder %v543_v41, 0.0  ;;  %vm822_vm5 = vcmp.ge.f32.partialorder %v572_v51, 0.0 }
  0xe4   :  { %1787 = vmatmul.msk.f32.gmra.mxu0 %vm947_vm10, %v2398_v17  ;;  %1791 = vmatmul.msk.f32.gmra.mxu1 %vm947_vm10, %v2398_v17  ;;  %v2497_v0 = vsel %vm821_vm4, 1.0, %v2891_v25  ;;  %v2500_v3 = vsel %vm822_vm5, 1.0, %v2891_v25 }
  0xe5   :  { %1088 = vmatpush.msrb.mxu0 %v2405_v18  ;;  %1117 = vmatpush.msrb.mxu1 %v2408_v19 }
  0xe6   :  { %v551_v22 = vpop.f32.mrf.mxu2  ;;  %v580_v23 = vpop.f32.mrf.mxu3 }
  0xe7   :  { %v552_v29 = vadd.f32 %v551_v22, %v2270_v2  ;;  %v581_v6 = vadd.f32 %v580_v23, %v2270_v2  ;;  %1089 = vmatpush.msrb.mxu0 %v2420_v24  ;;  %1118 = vmatpush.msrb.mxu1 %v2424_v28  ;;  %v2430_v33 = vpop.f32.mrf.mxu0  ;;  %v2432_v37 = vpop.f32.mrf.mxu1 }
  0xe8   :  { %v601_v27 = vadd.f32 %v2430_v33, %v2272_v9  ;;  %v630_v41 = vadd.f32 %v2432_v37, %v2272_v9 }
  0xe9   :  { %vm869_vm13 = vcmp.ge.f32.partialorder %v552_v29, 0.0  ;;  %vm870_vm14 = vcmp.ge.f32.partialorder %v581_v6, 0.0  ;;  %1090 = vmatpush.msrb.mxu0 %v2446_v39  ;;  %1119 = vmatpush.msrb.mxu1 %v2450_v40 }
  0xea   :  { %v2459_v52 = vsel %vm869_vm13, 1.0, %v2891_v25  ;;  %v2462_v56 = vsel %vm870_vm14, 1.0, %v2891_v25  ;;  %1795 = vmatmul.msk.f32.gmra.mxu2 %vm947_vm10, %v2398_v17  ;;  %1799 = vmatmul.msk.f32.gmra.mxu3 %vm947_vm10, %v2398_v17  ;;  %vm823_vm13 = vcmp.ge.f32.partialorder %v601_v27, 0.0  ;;  %vm824_vm14 = vcmp.ge.f32.partialorder %v630_v41, 0.0 }
  0xeb   :  { %1091 = vmatpush.msrb.mxu0 %v2436_v14  ;;  %1120 = vmatpush.msrb.mxu1 %v2440_v38 }
  0xec   :  { %1146 = vmatpush.msrb.mxu2 %v2459_v52  ;;  %1175 = vmatpush.msrb.mxu3 %v2462_v56 }
  0xed   :  { %1800 = vmatmul.msk.f32.vlgmr.msrb.gmra.mxu0 %vm947_vm10, %v2326_v44  ;;  %1804 = vmatmul.msk.f32.vlgmr.msrb.gmra.mxu1 %vm947_vm10, %v2326_v44 }
  0xee   :  { %1147 = vmatpush.msrb.mxu2 %v2477_v48  ;;  %1176 = vmatpush.msrb.mxu3 %v2480_v49  ;;  %v2484_v57 = vpop.f32.mrf.mxu2  ;;  %v2486_v58 = vpop.f32.mrf.mxu3 }
  0xef   :  { %v603_v62 = vpop.f32.mrf.mxu0  ;;  %v632_v63 = vpop.f32.mrf.mxu1 }
  0xf0   :  { %1148 = vmatpush.msrb.mxu2 %v2489_v59  ;;  %1177 = vmatpush.msrb.mxu3 %v2492_v61  ;;  %v604_v23 = vadd.f32 %v603_v62, %v2268_v1  ;;  %v633_v29 = vadd.f32 %v632_v63, %v2268_v1 }
  0xf2   :  { %1149 = vmatpush.msrb.mxu2 %v2497_v0  ;;  %1178 = vmatpush.msrb.mxu3 %v2500_v3  ;;  %vm839_vm11 = vcmp.ge.f32.partialorder %v604_v23, 0.0  ;;  %vm840_vm12 = vcmp.ge.f32.partialorder %v633_v29, 0.0  ;;  %v2582_v23 = vsel %vm824_vm14, 1.0, %v2891_v25  ;;  %v659_v29 = vadd.f32 %v2484_v57, %v2272_v9 }
  0xf3   :  { %1808 = vmatmul.msk.f32.vlgmr.msrb.gmra.mxu2 %vm947_vm10, %v2326_v44  ;;  %1812 = vmatmul.msk.f32.vlgmr.msrb.gmra.mxu3 %vm947_vm10, %v2326_v44  ;;  %2931 = vst [vmem:[#allocation19_spill] sm:$0xff] %v2582_v23 }
  0xf5   :  { %1801 = vmatmul.msk.f32.gmra.mxu0 %vm947_vm10, %v2370_v55  ;;  %1805 = vmatmul.msk.f32.gmra.mxu1 %vm947_vm10, %v2370_v55 }
  0xf6   :  { %v661_v5 = vpop.f32.mrf.mxu2  ;;  %v690_v7 = vpop.f32.mrf.mxu3 }
  0xf7   :  { %v606_v8 = vpop.f32.mrf.mxu0  ;;  %v635_v13 = vpop.f32.mrf.mxu1 }
  0xf8   :  { %v607_v4 = vadd.f32 %v606_v8, %v2274_v11  ;;  %v636_v15 = vadd.f32 %v635_v13, %v2274_v11 }
  0xfa   :  { %vm855_vm6 = vcmp.ge.f32.partialorder %v607_v4, 0.0  ;;  %vm856_vm7 = vcmp.ge.f32.partialorder %v636_v15, 0.0  ;;  %v2566_v15 = vsel %vm839_vm11, 1.0, %v2891_v25 }
  0xfb   :  { %1809 = vmatmul.msk.f32.gmra.mxu2 %vm947_vm10, %v2370_v55  ;;  %1813 = vmatmul.msk.f32.gmra.mxu3 %vm947_vm10, %v2370_v55  ;;  %v2548_v33 = vsel %vm855_vm6, 1.0, %v2891_v25  ;;  %v2552_v37 = vsel %vm856_vm7, 1.0, %v2891_v25  ;;  %2928 = vst [vmem:[#allocation16_spill] sm:$0xff] %v2566_v15  ;;  %vm825_vm6 = vcmp.ge.f32.partialorder %v659_v29, 0.0 }
  0xfc   :  { %2926 = vst [vmem:[#allocation14_spill] sm:$0xff] %v2548_v33 }
  0xfd   :  { %1802 = vmatmul.msk.f32.gmra.mxu0 %vm947_vm10, %v2380_v60  ;;  %1806 = vmatmul.msk.f32.gmra.mxu1 %vm947_vm10, %v2380_v60  ;;  %2927 = vst [vmem:[#allocation15_spill] sm:$0xff] %v2552_v37 }
  0xfe   :  { %v664_v16 = vpop.f32.mrf.mxu2  ;;  %v693_v20 = vpop.f32.mrf.mxu3 }
  0xff   :  { %v609_v21 = vpop.f32.mrf.mxu0  ;;  %v638_v22 = vpop.f32.mrf.mxu1  ;;  %v665_v63 = vadd.f32 %v664_v16, %v2274_v11  ;;  %v694_v8 = vadd.f32 %v693_v20, %v2274_v11  ;;  %v2570_v16 = vsel %vm840_vm12, 1.0, %v2891_v25  ;;  %v662_v20 = vadd.f32 %v661_v5, %v2268_v1 }
 0x100   :  { %v610_v6 = vadd.f32 %v609_v21, %v2270_v2  ;;  %v639_v12 = vadd.f32 %v638_v22, %v2270_v2  ;;  %2929 = vst [vmem:[#allocation17_spill] sm:$0xff] %v2570_v16  ;;  %v688_v5 = vadd.f32 %v2486_v58, %v2272_v9 }
 0x101   :  { %vm857_vm2 = vcmp.ge.f32.partialorder %v665_v63, 0.0  ;;  %vm858_vm3 = vcmp.ge.f32.partialorder %v694_v8, 0.0  ;;  %vm841_vm4 = vcmp.ge.f32.partialorder %v662_v20, 0.0 }
 0x102   :  { %vm871_vm8 = vcmp.ge.f32.partialorder %v610_v6, 0.0  ;;  %vm872_vm9 = vcmp.ge.f32.partialorder %v639_v12, 0.0  ;;  %v2607_v57 = vsel %vm857_vm2, 1.0, %v2891_v25  ;;  %v2610_v58 = vsel %vm858_vm3, 1.0, %v2891_v25 }
 0x103   :  { %v2531_v51 = vsel %vm871_vm8, 1.0, %v2891_v25  ;;  %v2534_v62 = vsel %vm872_vm9, 1.0, %v2891_v25  ;;  %1810 = vmatmul.msk.f32.gmra.mxu2 %vm947_vm10, %v2380_v60  ;;  %1814 = vmatmul.msk.f32.gmra.mxu3 %vm947_vm10, %v2380_v60  ;;  %2934 = vst [vmem:[#allocation22_spill] sm:$0xff] %v2607_v57  ;;  %vm826_vm7 = vcmp.ge.f32.partialorder %v688_v5, 0.0  ;;  %v2619_v63 = vsel %vm841_vm4, 1.0, %v2891_v25 }
 0x104   :  { %2924 = vst [vmem:[#allocation12_spill] sm:$0xff] %v2531_v51  ;;  %1204 = vmatpush.msra.mxu0 %v2531_v51  ;;  %1233 = vmatpush.msra.mxu1 %v2534_v62  ;;  %v2630_v20 = vsel %vm826_vm7, 1.0, %v2891_v25 }
 0x105   :  { %2925 = vst [vmem:[#allocation13_spill] sm:$0xff] %v2534_v62  ;;  %1803 = vmatmul.msk.f32.gmra.mxu0 %vm947_vm10, %v2398_v17  ;;  %1807 = vmatmul.msk.f32.gmra.mxu1 %vm947_vm10, %v2398_v17  ;;  %v691_v62 = vadd.f32 %v690_v7, %v2268_v1 }
 0x106   :  { %v667_v13 = vpop.f32.mrf.mxu2  ;;  %v696_v21 = vpop.f32.mrf.mxu3  ;;  %1205 = vmatpush.msra.mxu0 %v2548_v33  ;;  %1234 = vmatpush.msra.mxu1 %v2552_v37  ;;  %2935 = vst [vmem:[#allocation23_spill] sm:$0xff] %v2610_v58 }
 0x107   :  { %v668_v22 = vadd.f32 %v667_v13, %v2270_v2  ;;  %v697_v4 = vadd.f32 %v696_v21, %v2270_v2  ;;  %v2560_v6 = vpop.f32.mrf.mxu0  ;;  %v2562_v12 = vpop.f32.mrf.mxu1  ;;  %v2578_v13 = vsel %vm823_vm13, 1.0, %v2891_v25  ;;  %vm842_vm5 = vcmp.ge.f32.partialorder %v691_v62, 0.0  ;;  %2936 = vst [vmem:[#allocation24_spill] sm:$0xff] %v2619_v63 }
 0x108   :  { %1206 = vmatpush.msra.mxu0 %v2566_v15  ;;  %1235 = vmatpush.msra.mxu1 %v2570_v16  ;;  %2930 = vst [vmem:[#allocation18_spill] sm:$0xff] %v2578_v13  ;;  %v2622_v8 = vsel %vm842_vm5, 1.0, %v2891_v25  ;;  %v717_v37 = vadd.f32 %v2560_v6, %v2272_v9 }
 0x109   :  { %vm873_vm15 = vcmp.ge.f32.partialorder %v668_v22, 0.0  ;;  %vm874_vm1 = vcmp.ge.f32.partialorder %v697_v4, 0.0  ;;  %2937 = vst [vmem:[#allocation25_spill] sm:$0xff] %v2622_v8  ;;  %v2627_v4 = vsel %vm825_vm6, 1.0, %v2891_v25 }
 0x10a   :  { %v2589_v7 = vsel %vm873_vm15, 1.0, %v2891_v25  ;;  %v2592_v27 = vsel %vm874_vm1, 1.0, %v2891_v25  ;;  %1207 = vmatpush.msra.mxu0 %v2578_v13  ;;  %1236 = vmatpush.msra.mxu1 %v2582_v23  ;;  %2938 = vst [vmem:[#allocation26_spill] sm:$0xff] %v2627_v4  ;;  %vm827_vm15 = vcmp.ge.f32.partialorder %v717_v37, 0.0 }
 0x10b   :  { %2932 = vst [vmem:[#allocation20_spill] sm:$0xff] %v2589_v7  ;;  %1811 = vmatmul.msk.f32.gmra.mxu2 %vm947_vm10, %v2398_v17  ;;  %1815 = vmatmul.msk.f32.gmra.mxu3 %vm947_vm10, %v2398_v17 }
 0x10c   :  { %2933 = vst [vmem:[#allocation21_spill] sm:$0xff] %v2592_v27  ;;  %1262 = vmatpush.msra.mxu2 %v2589_v7  ;;  %1291 = vmatpush.msra.mxu3 %v2592_v27 }
 0x10d   :  { %1816 = vmatmul.msk.f32.vlgmr.msra.gmra.mxu0 %vm947_vm10, %v2326_v44  ;;  %1820 = vmatmul.msk.f32.vlgmr.msra.gmra.mxu1 %vm947_vm10, %v2326_v44  ;;  %2939 = vst [vmem:[#allocation27_spill] sm:$0xff] %v2630_v20 }
 0x10e   :  { %1263 = vmatpush.msra.mxu2 %v2607_v57  ;;  %1292 = vmatpush.msra.mxu3 %v2610_v58  ;;  %v2614_v41 = vpop.f32.mrf.mxu2  ;;  %v2616_v62 = vpop.f32.mrf.mxu3 }
 0x10f   :  { %v719_v21 = vpop.f32.mrf.mxu0  ;;  %v748_v22 = vpop.f32.mrf.mxu1 }
 0x110   :  { %1264 = vmatpush.msra.mxu2 %v2619_v63  ;;  %1293 = vmatpush.msra.mxu3 %v2622_v8  ;;  %v720_v63 = vadd.f32 %v719_v21, %v2268_v1  ;;  %v749_v51 = vadd.f32 %v748_v22, %v2268_v1 }
 0x112   :  { %1265 = vmatpush.msra.mxu2 %v2627_v4  ;;  %1294 = vmatpush.msra.mxu3 %v2630_v20  ;;  %vm843_vm13 = vcmp.ge.f32.partialorder %v720_v63, 0.0  ;;  %vm844_vm14 = vcmp.ge.f32.partialorder %v749_v51, 0.0  ;;  %v775_v51 = vadd.f32 %v2614_v41, %v2272_v9  ;;  %v804_v63 = vadd.f32 %v2616_v62, %v2272_v9 }
 0x113   :  { %1824 = vmatmul.msk.f32.vlgmr.msra.gmra.mxu2 %vm947_vm10, %v2326_v44  ;;  %1828 = vmatmul.msk.f32.vlgmr.msra.gmra.mxu3 %vm947_vm10, %v2326_v44 }
 0x115   :  { %1817 = vmatmul.msk.f32.gmra.mxu0 %vm947_vm10, %v2370_v55  ;;  %1821 = vmatmul.msk.f32.gmra.mxu1 %vm947_vm10, %v2370_v55 }
 0x116   :  { %v777_v29 = vpop.f32.mrf.mxu2  ;;  %v806_v5 = vpop.f32.mrf.mxu3 }
 0x117   :  { %v722_v25 = vpop.f32.mrf.mxu0  ;;  %v751_v27 = vpop.f32.mrf.mxu1 }
 0x118   :  { %v723_v7 = vadd.f32 %v722_v25, %v2274_v11  ;;  %v752_v58 = vadd.f32 %v751_v27, %v2274_v11  ;;  %v746_v25 = vadd.f32 %v2562_v12, %v2272_v9  ;;  %v2940_v27 = vmov 0.2  }
 0x11a   :  { %vm859_vm8 = vcmp.ge.f32.partialorder %v723_v7, 0.0  ;;  %vm860_vm9 = vcmp.ge.f32.partialorder %v752_v58, 0.0  ;;  %vm828_vm1 = vcmp.ge.f32.partialorder %v746_v25, 0.0  ;;  %v2696_v58 = vsel %vm844_vm14, 1.0, %v2940_v27 }
 0x11b   :  { %1825 = vmatmul.msk.f32.gmra.mxu2 %vm947_vm10, %v2370_v55  ;;  %1829 = vmatmul.msk.f32.gmra.mxu3 %vm947_vm10, %v2370_v55  ;;  %v2682_v6 = vsel %vm860_vm9, 1.0, %v2940_v27  ;;  %2946 = vst [vmem:[#allocation33_spill] sm:$0xff] %v2696_v58  ;;  %vm830_vm9 = vcmp.ge.f32.partialorder %v804_v63, 0.0  ;;  %vm1670_vm14 = vcmask 1046534  }
 0x11c   :  { %2944 = vst [vmem:[#allocation31_spill] sm:$0xff] %v2682_v6  ;;  %v2752_v25 = vsel %vm830_vm9, 1.0, %v2940_v27 }
 0x11d   :  { %1818 = vmatmul.msk.f32.gmra.mxu0 %vm947_vm10, %v2380_v60  ;;  %1822 = vmatmul.msk.f32.gmra.mxu1 %vm947_vm10, %v2380_v60  ;;  %2956 = vst [vmem:[#allocation43_spill] sm:$0xff] %v2752_v25 }
 0x11e   :  { %v780_v57 = vpop.f32.mrf.mxu2  ;;  %v809_v20 = vpop.f32.mrf.mxu3 }
 0x11f   :  { %v725_v4 = vpop.f32.mrf.mxu0  ;;  %v754_v8 = vpop.f32.mrf.mxu1  ;;  %v781_v12 = vadd.f32 %v780_v57, %v2274_v11  ;;  %v807_v57 = vadd.f32 %v806_v5, %v2268_v1 }
 0x120   :  { %v726_v33 = vadd.f32 %v725_v4, %v2270_v2  ;;  %v755_v13 = vadd.f32 %v754_v8, %v2270_v2 }
 0x121   :  { %vm861_vm4 = vcmp.ge.f32.partialorder %v781_v12, 0.0  ;;  %vm846_vm7 = vcmp.ge.f32.partialorder %v807_v57, 0.0 }
 0x122   :  { %vm875_vm11 = vcmp.ge.f32.partialorder %v726_v33, 0.0  ;;  %vm876_vm12 = vcmp.ge.f32.partialorder %v755_v13, 0.0  ;;  %v2678_v33 = vsel %vm859_vm8, 1.0, %v2940_v27  ;;  %v810_v13 = vadd.f32 %v809_v20, %v2274_v11 }
 0x123   :  { %v2661_v23 = vsel %vm875_vm11, 1.0, %v2940_v27  ;;  %v2664_v21 = vsel %vm876_vm12, 1.0, %v2940_v27  ;;  %1826 = vmatmul.msk.f32.gmra.mxu2 %vm947_vm10, %v2380_v60  ;;  %1830 = vmatmul.msk.f32.gmra.mxu3 %vm947_vm10, %v2380_v60  ;;  %2943 = vst [vmem:[#allocation30_spill] sm:$0xff] %v2678_v33  ;;  %v778_v11 = vadd.f32 %v777_v29, %v2268_v1  ;;  %v2704_v20 = vsel %vm827_vm15, 1.0, %v2940_v27 }
 0x124   :  { %2941 = vst [vmem:[#allocation28_spill] sm:$0xff] %v2661_v23  ;;  %1320 = vmatpush.msrb.mxu0 %v2661_v23  ;;  %1349 = vmatpush.msrb.mxu1 %v2664_v21  ;;  %vm862_vm5 = vcmp.ge.f32.partialorder %v810_v13, 0.0  ;;  %v2733_v9 = vsel %vm861_vm4, 1.0, %v2940_v27  ;;  %vm829_vm8 = vcmp.ge.f32.partialorder %v775_v51, 0.0  ;;  %v2744_v29 = vsel %vm846_vm7, 1.0, %v2940_v27 }
 0x125   :  { %2942 = vst [vmem:[#allocation29_spill] sm:$0xff] %v2664_v21  ;;  %1819 = vmatmul.msk.f32.gmra.mxu0 %vm947_vm10, %v2398_v17  ;;  %1823 = vmatmul.msk.f32.gmra.mxu1 %vm947_vm10, %v2398_v17  ;;  %v2692_v21 = vsel %vm843_vm13, 1.0, %v2940_v27  ;;  %vm845_vm6 = vcmp.ge.f32.partialorder %v778_v11, 0.0  ;;  %v2736_v41 = vsel %vm862_vm5, 1.0, %v2940_v27  ;;  %v2749_v5 = vsel %vm829_vm8, 1.0, %v2940_v27 }
 0x126   :  { %v783_v8 = vpop.f32.mrf.mxu2  ;;  %v812_v22 = vpop.f32.mrf.mxu3  ;;  %1321 = vmatpush.msrb.mxu0 %v2678_v33  ;;  %1350 = vmatpush.msrb.mxu1 %v2682_v6  ;;  %2945 = vst [vmem:[#allocation32_spill] sm:$0xff] %v2692_v21  ;;  %v2741_v62 = vsel %vm845_vm6, 1.0, %v2940_v27  ;;  %vm1664_vm11 = vcmask 1042434   ;;  %vm1666_vm12 = vcmask 1041408   ;;  %vm1668_vm13 = vcmask 1044484  }
 0x127   :  { %v784_v4 = vadd.f32 %v783_v8, %v2270_v2  ;;  %v813_v7 = vadd.f32 %v812_v22, %v2270_v2  ;;  %2947 = vst [vmem:[#allocation34_spill] sm:$0xff] %v2704_v20  ;;  %v2708_v2 = vsel %vm828_vm1, 1.0, %v2940_v27  ;;  %vm1672_vm15 = vcmask 1045508  }
 0x128   :  { %1322 = vmatpush.msrb.mxu0 %v2692_v21  ;;  %1351 = vmatpush.msrb.mxu1 %v2696_v58  ;;  %2948 = vst [vmem:[#allocation35_spill] sm:$0xff] %v2708_v2 }
 0x129   :  { %vm877_vm2 = vcmp.ge.f32.partialorder %v784_v4, 0.0  ;;  %vm878_vm3 = vcmp.ge.f32.partialorder %v813_v7, 0.0  ;;  %2951 = vst [vmem:[#allocation38_spill] sm:$0xff] %v2733_v9 }
 0x12a   :  { %v2715_v1 = vsel %vm877_vm2, 1.0, %v2940_v27  ;;  %v2718_v37 = vsel %vm878_vm3, 1.0, %v2940_v27  ;;  %1323 = vmatpush.msrb.mxu0 %v2704_v20  ;;  %1352 = vmatpush.msrb.mxu1 %v2708_v2  ;;  %2952 = vst [vmem:[#allocation39_spill] sm:$0xff] %v2736_v41 }
 0x12b   :  { %2949 = vst [vmem:[#allocation36_spill] sm:$0xff] %v2715_v1  ;;  %1827 = vmatmul.msk.f32.gmra.mxu2 %vm947_vm10, %v2398_v17  ;;  %1831 = vmatmul.msk.f32.gmra.mxu3 %vm947_vm10, %v2398_v17 }
 0x12c   :  { %2950 = vst [vmem:[#allocation37_spill] sm:$0xff] %v2718_v37  ;;  %1378 = vmatpush.msrb.mxu2 %v2715_v1  ;;  %1407 = vmatpush.msrb.mxu3 %v2718_v37 }
 0x12d   :  { %1832 = vmatmul.msk.f32.vlgmr.msrb.gmra.mxu0 %vm947_vm10, %v2326_v44  ;;  %1836 = vmatmul.msk.f32.vlgmr.msrb.gmra.mxu1 %vm947_vm10, %v2326_v44  ;;  %2953 = vst [vmem:[#allocation40_spill] sm:$0xff] %v2741_v62 }
 0x12e   :  { %1379 = vmatpush.msrb.mxu2 %v2733_v9  ;;  %1408 = vmatpush.msrb.mxu3 %v2736_v41  ;;  %2954 = vst [vmem:[#allocation41_spill] sm:$0xff] %v2744_v29 }
 0x12f   :  { %2955 = vst [vmem:[#allocation42_spill] sm:$0xff] %v2749_v5 }
 0x130   :  { %1380 = vmatpush.msrb.mxu2 %v2741_v62  ;;  %1409 = vmatpush.msrb.mxu3 %v2744_v29 }
 0x132   :  { %1381 = vmatpush.msrb.mxu2 %v2749_v5  ;;  %1410 = vmatpush.msrb.mxu3 %v2752_v25 }
 0x133   :  { %1840 = vmatmul.msk.f32.vlgmr.msrb.gmra.mxu2 %vm947_vm10, %v2326_v44  ;;  %1844 = vmatmul.msk.f32.vlgmr.msrb.gmra.mxu3 %vm947_vm10, %v2326_v44 }
 0x135   :  { %1833 = vmatmul.msk.f32.gmra.mxu0 %vm947_vm10, %v2370_v55  ;;  %1837 = vmatmul.msk.f32.gmra.mxu1 %vm947_vm10, %v2370_v55 }
 0x13b   :  { %1841 = vmatmul.msk.f32.gmra.mxu2 %vm947_vm10, %v2370_v55  ;;  %1845 = vmatmul.msk.f32.gmra.mxu3 %vm947_vm10, %v2370_v55 }
 0x13d   :  { %1834 = vmatmul.msk.f32.gmra.mxu0 %vm947_vm10, %v2380_v60  ;;  %1838 = vmatmul.msk.f32.gmra.mxu1 %vm947_vm10, %v2380_v60 }
 0x143   :  { %1842 = vmatmul.msk.f32.gmra.mxu2 %vm947_vm10, %v2380_v60  ;;  %1846 = vmatmul.msk.f32.gmra.mxu3 %vm947_vm10, %v2380_v60 }
 0x145   :  { %1835 = vmatmul.msk.f32.gmra.mxu0 %vm947_vm10, %v2398_v17  ;;  %1839 = vmatmul.msk.f32.gmra.mxu1 %vm947_vm10, %v2398_v17 }
 0x149   :  { %v977_v44 = vpop.f32.mrf.mxu0  ;;  %v1006_v55 = vpop.f32.mrf.mxu1 }
 0x14a   :  { %v1425_v21 = vmul.f32 %v1006_v55, %v2324_v42 }
 0x14b   :  { %1843 = vmatmul.msk.f32.gmra.mxu2 %vm947_vm10, %v2398_v17  ;;  %1847 = vmatmul.msk.f32.gmra.mxu3 %vm947_vm10, %v2398_v17  ;;  %vm1662_vm10 = vcmask 1040384  }
 0x151   :  { %v980_v27 = vpop.f32.mrf.mxu0  ;;  %v1009_v12 = vpop.f32.mrf.mxu1 }
 0x152   :  { %v1441_v6 = vmul.f32 %v1009_v12, %v2308_v35 }
 0x154   :  { %v1497_v12 = vadd.f32 %v1441_v6, %v1425_v21 }
 0x155   :  { %v1035_v13 = vpop.f32.mrf.mxu2  ;;  %v1064_v8 = vpop.f32.mrf.mxu3 }
 0x156   :  { %v1426_v33 = vmul.f32 %v1035_v13, %v2363_v53  ;;  %v1427_v2 = vmul.f32 %v1064_v8, %v2366_v54  ;;  %v1440_v53 = vmul.f32 %v980_v27, %v2304_v34 }
 0x159   :  { %v983_v22 = vpop.f32.mrf.mxu0  ;;  %v1012_v60 = vpop.f32.mrf.mxu1 }
 0x15d   :  { %v1038_v4 = vpop.f32.mrf.mxu2  ;;  %v1067_v7 = vpop.f32.mrf.mxu3 }
 0x15e   :  { %v1442_v17 = vmul.f32 %v1038_v4, %v2355_v50  ;;  %v1443_v29 = vmul.f32 %v1067_v7, %v2358_v43  ;;  %v1457_v50 = vmul.f32 %v1012_v60, %v2298_v32 }
 0x160   :  { %v1506_v4 = vadd.f32 %v1442_v17, %v1426_v33  ;;  %v1515_v43 = vadd.f32 %v1443_v29, %v1427_v2  ;;  %v1456_v33 = vmul.f32 %v983_v22, %v2295_v31 }
 0x161   :  { %v986_v11 = vpop.f32.mrf.mxu0  ;;  %v1015_v57 = vpop.f32.mrf.mxu1 }
 0x162   :  { %v1473_v54 = vmul.f32 %v1015_v57, %v2288_v10 }
 0x165   :  { %v1041_v51 = vpop.f32.mrf.mxu2  ;;  %v1070_v63 = vpop.f32.mrf.mxu3 }
 0x166   :  { %v1458_v20 = vmul.f32 %v1041_v51, %v2343_v46  ;;  %v1459_v58 = vmul.f32 %v1070_v63, %v2346_v47  ;;  %v1424_v47 = vmul.f32 %v977_v44, %v2312_v36 }
 0x168   :  { %v1507_v46 = vadd.f32 %v1506_v4, %v1458_v20  ;;  %v1516_v13 = vadd.f32 %v1515_v43, %v1459_v58  ;;  %v1488_v36 = vadd.f32 %v1440_v53, %v1424_v47 }
 0x16a   :  { %v1093_v37 = vpop.f32.mrf.mxu0  ;;  %v1122_v1 = vpop.f32.mrf.mxu1  ;;  %v1489_v31 = vadd.f32 %v1488_v36, %v1456_v33 }
 0x16b   :  { %v1428_v34 = vmul.f32 %v1093_v37, %v2436_v14  ;;  %v1429_v21 = vmul.f32 %v1122_v1, %v2440_v38 }
 0x16d   :  { %v1044_v41 = vpop.f32.mrf.mxu2  ;;  %v1073_v9 = vpop.f32.mrf.mxu3 }
 0x16e   :  { %v1474_v7 = vmul.f32 %v1044_v41, %v2329_v45  ;;  %v1475_v15 = vmul.f32 %v1073_v9, %v2332_v30  ;;  %v1498_v45 = vadd.f32 %v1497_v12, %v1457_v50 }
 0x170   :  { %v1508_v2 = vadd.f32 %v1507_v46, %v1474_v7  ;;  %v1517_v30 = vadd.f32 %v1516_v13, %v1475_v15  ;;  %v1499_v58 = vadd.f32 %v1498_v45, %v1473_v54 }
 0x172   :  { %v1096_v25 = vpop.f32.mrf.mxu0  ;;  %v1125_v5 = vpop.f32.mrf.mxu1  ;;  %v1509_v29 = vrot.slane %v1508_v2, 4 }
 0x173   :  { %v1444_v42 = vmul.f32 %v1096_v25, %v2446_v39  ;;  %v1445_v32 = vmul.f32 %v1125_v5, %v2450_v40  ;;  %v1472_v39 = vmul.f32 %v986_v11, %v2285_v26  ;;  %v1518_v5 = vrot.slane %v1517_v30, 4 }
 0x174   :  { %v1510_v37 = vadd.f32 %v1509_v29, %v1508_v2 }
 0x175   :  { %v1524_v40 = vadd.f32 %v1444_v42, %v1428_v34  ;;  %v1533_v20 = vadd.f32 %v1445_v32, %v1429_v21  ;;  %v1519_v26 = vadd.f32 %v1518_v5, %v1517_v30 }
 0x176   :  { %v2786_v62 = vpop.f32.mrf.mxu2  ;;  %v2788_v23 = vpop.f32.mrf.mxu3  ;;  %v1511_v50 = vrot.slane %v1510_v37, 2 }
 0x177   :  { %v1430_v7 = vmul.f32 %v2786_v62, %v2497_v0 }
 0x178   :  { %v1512_v42 = vadd.f32 %v1511_v50, %v1510_v37  ;;  %v2957_v50 = vld [vmem:[#allocation17_spill] sm:$0xff] }
 0x17a   :  { %v1099_v16 = vpop.f32.mrf.mxu0  ;;  %v1128_v35 = vpop.f32.mrf.mxu1  ;;  %v1513_v34 = vrot.slane %v1512_v42, 1 }
 0x17b   :  { %v1460_v10 = vmul.f32 %v1099_v16, %v2420_v24  ;;  %v1461_v6 = vmul.f32 %v1128_v35, %v2424_v28  ;;  %v1490_v24 = vadd.f32 %v1489_v31, %v1472_v39  ;;  %v1500_v16 = vrot.slane %v1499_v58, 4 }
 0x17c   :  { %v1431_v35 = vmul.f32 %v2788_v23, %v2500_v3  ;;  %v1514_v5 = vadd.f32 %v1513_v34, %v1512_v42  ;;  %v2963_v34 = vld [vmem:[#allocation12_spill] sm:$0xff] }
 0x17d   :  { %v1525_v44 = vadd.f32 %v1524_v40, %v1460_v10  ;;  %v1534_v55 = vadd.f32 %v1533_v20, %v1461_v6  ;;  %v1491_v11 = vrot.slane %v1490_v24, 4  ;;  %v1501_v57 = vadd.f32 %v1500_v16, %v1499_v58 }
 0x17e   :  { %v1154_v9 = vpop.f32.mrf.mxu2  ;;  %v1183_v41 = vpop.f32.mrf.mxu3  ;;  %v1649_v37 = vrot.slane %v1514_v5, 6  ;;  %v2966_v5 = vld [vmem:[#allocation25_spill] sm:$0xff] }
 0x17f   :  { %v1446_v51 = vmul.f32 %v1154_v9, %v2489_v59  ;;  %v1447_v63 = vmul.f32 %v1183_v41, %v2492_v61  ;;  %v1492_v12 = vadd.f32 %v1491_v11, %v1490_v24  ;;  %v1502_v61 = vrot.slane %v1501_v57, 2 }
 0x181   :  { %v1542_v46 = vadd.f32 %v1446_v51, %v1430_v7  ;;  %v1551_v13 = vadd.f32 %v1447_v63, %v1431_v35  ;;  %v1493_v23 = vrot.slane %v1492_v12, 2  ;;  %v2958_v7 = vld [vmem:[#allocation16_spill] sm:$0xff] }
 0x182   :  { %v1102_v15 = vpop.f32.mrf.mxu0  ;;  %v1131_v25 = vpop.f32.mrf.mxu1 }
 0x183   :  { %v1476_v14 = vmul.f32 %v1102_v15, %v2405_v18  ;;  %v1477_v38 = vmul.f32 %v1131_v25, %v2408_v19  ;;  %v1520_v19 = vrot.slane %v1519_v26, 2  ;;  %v1494_v58 = vadd.f32 %v1493_v23, %v1492_v12 }
 0x185   :  { %v1526_v28 = vadd.f32 %v1525_v44, %v1476_v14  ;;  %v1535_v1 = vadd.f32 %v1534_v55, %v1477_v38  ;;  %v1521_v32 = vadd.f32 %v1520_v19, %v1519_v26  ;;  %v1495_v14 = vrot.slane %v1494_v58, 1 }
 0x186   :  { %v1157_v27 = vpop.f32.mrf.mxu2  ;;  %v1186_v8 = vpop.f32.mrf.mxu3 }
 0x187   :  { %v1527_v22 = vrot.slane %v1526_v28, 4  ;;  %v1536_v60 = vrot.slane %v1535_v1, 4  ;;  %v1462_v53 = vmul.f32 %v1157_v27, %v2477_v48  ;;  %v1463_v59 = vmul.f32 %v1186_v8, %v2480_v49 }
 0x188   :  { %v1503_v48 = vadd.f32 %v1502_v61, %v1501_v57  ;;  %v1522_v21 = vrot.slane %v1521_v32, 1  ;;  %v1496_v11 = vadd.f32 %v1495_v14, %v1494_v58  ;;  %v2959_v61 = vld [vmem:[#allocation19_spill] sm:$0xff] }
 0x189   :  { %v1528_v17 = vadd.f32 %v1527_v22, %v1526_v28  ;;  %v1537_v18 = vadd.f32 %v1536_v60, %v1535_v1  ;;  %v1543_v2 = vadd.f32 %v1542_v46, %v1462_v53  ;;  %v1552_v30 = vadd.f32 %v1551_v13, %v1463_v59 }
 0x18a   :  { %v2814_v4 = vpop.f32.mrf.mxu0  ;;  %v2816_v43 = vpop.f32.mrf.mxu1  ;;  %v1504_v40 = vrot.slane %v1503_v48, 1 }
 0x18b   :  { %v1529_v54 = vrot.slane %v1528_v17, 2  ;;  %v1538_v47 = vrot.slane %v1537_v18, 2 }
 0x18c   :  { %v1505_v38 = vadd.f32 %v1504_v40, %v1503_v48 }
 0x18d   :  { %v1530_v62 = vadd.f32 %v1529_v54, %v1528_v17  ;;  %v1539_v49 = vadd.f32 %v1538_v47, %v1537_v18  ;;  %v1433_v54 = vmul.f32 %v2816_v43, %v2959_v61  ;;  %v2960_v47 = vld [vmem:[#allocation15_spill] sm:$0xff] }
 0x18e   :  { %v1160_v33 = vpop.f32.mrf.mxu2  ;;  %v1189_v45 = vpop.f32.mrf.mxu3  ;;  %v1648_v57 = vrot.slane %v1505_v38, 7 }
 0x18f   :  { %v1478_v0 = vmul.f32 %v1160_v33, %v2459_v52  ;;  %v1479_v3 = vmul.f32 %v1189_v45, %v2462_v56  ;;  %v1531_v20 = vrot.slane %v1530_v62, 1  ;;  %v1540_v31 = vrot.slane %v1539_v49, 1  ;;  %v2962_v45 = vld [vmem:[#allocation14_spill] sm:$0xff] }
 0x190   :  { %v1523_v56 = vadd.f32 %v1522_v21, %v1521_v32  ;;  %v2961_v32 = vld [vmem:[#allocation18_spill] sm:$0xff] }
 0x191   :  { %v1544_v9 = vadd.f32 %v1543_v2, %v1478_v0  ;;  %v1553_v41 = vadd.f32 %v1552_v30, %v1479_v3  ;;  %v1532_v24 = vadd.f32 %v1531_v20, %v1530_v62  ;;  %v1541_v16 = vadd.f32 %v1540_v31, %v1539_v49 }
 0x192   :  { %v1212_v10 = vpop.f32.mrf.mxu0  ;;  %v1241_v6 = vpop.f32.mrf.mxu1  ;;  %v1650_v26 = vrot.slane %v1523_v56, 5  ;;  %v1432_v33 = vmul.f32 %v2814_v4, %v2961_v32  ;;  %v1663_v0 = vsel %vm1662_vm10, %v1496_v11, %v1648_v57  ;;  %v2964_v4 = vld [vmem:[#allocation13_spill] sm:$0xff] }
 0x193   :  { %v1545_v36 = vrot.slane %v1544_v9, 4  ;;  %v1554_v39 = vrot.slane %v1553_v41, 4  ;;  %v1651_v51 = vrot.slane %v1532_v24, 4  ;;  %v1652_v63 = vrot.slane %v1541_v16, 3  ;;  %v2967_v24 = vld [vmem:[#allocation26_spill] sm:$0xff] }
 0x194   :  { %v1449_v19 = vmul.f32 %v1241_v6, %v2957_v50  ;;  %v1448_v35 = vmul.f32 %v1212_v10, %v2958_v7  ;;  %v1665_v12 = vsel %vm1664_vm11, %v1649_v37, %v1650_v26  ;;  %v2969_v37 = vld [vmem:[#allocation22_spill] sm:$0xff]  ;;  %v2971_v50 = vld [vmem:[#allocation20_spill] sm:$0xff]  ;;  %v2972_v7 = vld [vmem:[#allocation21_spill] sm:$0xff] }
 0x195   :  { %v1546_v29 = vadd.f32 %v1545_v36, %v1544_v9  ;;  %v1555_v52 = vadd.f32 %v1554_v39, %v1553_v41  ;;  %v1669_v3 = vsel %vm1668_vm13, %v1651_v51, %v1652_v63  ;;  %v1667_v43 = vsel %vm1666_vm12, %v1663_v0, %v1665_v12 }
 0x196   :  { %v2826_v15 = vpop.f32.mrf.mxu2  ;;  %v2828_v25 = vpop.f32.mrf.mxu3  ;;  %v1569_v30 = vadd.f32 %v1449_v19, %v1433_v54  ;;  %v1560_v48 = vadd.f32 %v1448_v35, %v1432_v33 }
 0x197   :  { %v1547_v44 = vrot.slane %v1546_v29, 2  ;;  %v1556_v55 = vrot.slane %v1555_v52, 2  ;;  %v1434_v16 = vmul.f32 %v2826_v15, %v2967_v24  ;;  %v2978_v24 = vld [vmem:[#allocation31_spill] sm:$0xff] }
 0x199   :  { %v1548_v28 = vadd.f32 %v1547_v44, %v1546_v29  ;;  %v1557_v1 = vadd.f32 %v1556_v55, %v1555_v52  ;;  %v2965_v29 = vld [vmem:[#allocation24_spill] sm:$0xff] }
 0x19a   :  { %v1215_v27 = vpop.f32.mrf.mxu0  ;;  %v1244_v8 = vpop.f32.mrf.mxu1 }
 0x19b   :  { %v1549_v22 = vrot.slane %v1548_v28, 1  ;;  %v1558_v60 = vrot.slane %v1557_v1, 1  ;;  %v1465_v42 = vmul.f32 %v1244_v8, %v2960_v47  ;;  %v1464_v2 = vmul.f32 %v1215_v27, %v2962_v45  ;;  %v2970_v27 = vld [vmem:[#allocation23_spill] sm:$0xff] }
 0x19d   :  { %v1550_v17 = vadd.f32 %v1549_v22, %v1548_v28  ;;  %v1559_v18 = vadd.f32 %v1558_v60, %v1557_v1  ;;  %v1570_v41 = vadd.f32 %v1569_v30, %v1465_v42  ;;  %v1561_v36 = vadd.f32 %v1560_v48, %v1464_v2  ;;  %v2968_v28 = vld [vmem:[#allocation27_spill] sm:$0xff] }
 0x19e   :  { %v1270_v53 = vpop.f32.mrf.mxu2  ;;  %v1299_v59 = vpop.f32.mrf.mxu3  ;;  %v1435_v1 = vmul.f32 %v2828_v25, %v2968_v28 }
 0x19f   :  { %v1653_v46 = vrot.slane %v1550_v17, 2  ;;  %v1654_v13 = vrot.slane %v1559_v18, 1  ;;  %v1450_v52 = vmul.f32 %v1270_v53, %v2965_v29  ;;  %v1451_v56 = vmul.f32 %v1299_v59, %v2966_v5 }
 0x1a1   :  { %v1671_v23 = vsel %vm1670_vm14, %v1653_v46, %v1654_v13  ;;  %v1578_v60 = vadd.f32 %v1450_v52, %v1434_v16  ;;  %v1587_v11 = vadd.f32 %v1451_v56, %v1435_v1 }
 0x1a2   :  { %v1218_v62 = vpop.f32.mrf.mxu0  ;;  %v1247_v49 = vpop.f32.mrf.mxu1  ;;  %v1673_v9 = vsel %vm1672_vm15, %v1669_v3, %v1671_v23 }
 0x1a3   :  { %v1480_v21 = vmul.f32 %v1218_v62, %v2963_v34  ;;  %v1481_v10 = vmul.f32 %v1247_v49, %v2964_v4  ;;  %v1674_v6 = vsel %vm218_vm0, %v1667_v43, %v1673_v9  ;;  %v2973_v4 = vld [vmem:[#allocation32_spill] sm:$0xff] }
 0x1a4   :  { %1684 = vst [vmem:[#allocation8] sm:$0xff] %v1674_v6  ;;  %v2974_v6 = vld [vmem:[#allocation33_spill] sm:$0xff] }
 0x1a5   :  { %v1571_v39 = vadd.f32 %v1570_v41, %v1481_v10  ;;  %v1562_v58 = vadd.f32 %v1561_v36, %v1480_v21 }
 0x1a6   :  { %v1273_v40 = vpop.f32.mrf.mxu2  ;;  %v1302_v20 = vpop.f32.mrf.mxu3 }
 0x1a7   :  { %v1572_v31 = vrot.slane %v1571_v39, 4  ;;  %v1563_v55 = vrot.slane %v1562_v58, 4  ;;  %v1466_v26 = vmul.f32 %v1273_v40, %v2969_v37  ;;  %v1467_v8 = vmul.f32 %v1302_v20, %v2970_v27  ;;  %v2976_v20 = vld [vmem:[#allocation35_spill] sm:$0xff] }
 0x1a9   :  { %v1573_v44 = vadd.f32 %v1572_v31, %v1571_v39  ;;  %v1564_v57 = vadd.f32 %v1563_v55, %v1562_v58  ;;  %v1579_v17 = vadd.f32 %v1578_v60, %v1466_v26  ;;  %v1588_v18 = vadd.f32 %v1587_v11, %v1467_v8  ;;  %v2975_v58 = vld [vmem:[#allocation34_spill] sm:$0xff]  ;;  %v2979_v60 = vld [vmem:[#allocation28_spill] sm:$0xff] }
 0x1aa   :  { %v1325_v14 = vpop.f32.mrf.mxu0  ;;  %v1354_v38 = vpop.f32.mrf.mxu1 }
 0x1ab   :  { %v1574_v22 = vrot.slane %v1573_v44, 2  ;;  %v1565_v25 = vrot.slane %v1564_v57, 2  ;;  %v1436_v40 = vmul.f32 %v1325_v14, %v2975_v58  ;;  %v1437_v31 = vmul.f32 %v1354_v38, %v2976_v20 }
 0x1ad   :  { %v1575_v15 = vadd.f32 %v1574_v22, %v1573_v44  ;;  %v1566_v32 = vadd.f32 %v1565_v25, %v1564_v57  ;;  %v2977_v44 = vld [vmem:[#allocation30_spill] sm:$0xff]  ;;  %v2980_v57 = vld [vmem:[#allocation29_spill] sm:$0xff] }
 0x1ae   :  { %v1276_v51 = vpop.f32.mrf.mxu2  ;;  %v1305_v63 = vpop.f32.mrf.mxu3 }
 0x1af   :  { %v1482_v19 = vmul.f32 %v1276_v51, %v2971_v50  ;;  %v1483_v35 = vmul.f32 %v1305_v63, %v2972_v7  ;;  %v1576_v13 = vrot.slane %v1575_v15, 1  ;;  %v1567_v48 = vrot.slane %v1566_v32, 1 }
 0x1b1   :  { %v1580_v53 = vadd.f32 %v1579_v17, %v1482_v19  ;;  %v1589_v59 = vadd.f32 %v1588_v18, %v1483_v35  ;;  %v1577_v0 = vadd.f32 %v1576_v13, %v1575_v15  ;;  %v1568_v39 = vadd.f32 %v1567_v48, %v1566_v32  ;;  %v2981_v35 = vld [vmem:[#allocation40_spill] sm:$0xff]  ;;  %v2986_v32 = vld [vmem:[#allocation39_spill] sm:$0xff] }
 0x1b2   :  { %v1328_v12 = vpop.f32.mrf.mxu0  ;;  %v1357_v61 = vpop.f32.mrf.mxu1 }
 0x1b3   :  { %v1581_v54 = vrot.slane %v1580_v53, 4  ;;  %v1590_v46 = vrot.slane %v1589_v59, 4  ;;  %v1655_v41 = vrot.slane %v1577_v0, 7  ;;  %v1452_v10 = vmul.f32 %v1328_v12, %v2973_v4 }
 0x1b4   :  { %v1453_v36 = vmul.f32 %v1357_v61, %v2974_v6  ;;  %v2983_v61 = vld [vmem:[#allocation42_spill] sm:$0xff] }
 0x1b5   :  { %v1582_v47 = vadd.f32 %v1581_v54, %v1580_v53  ;;  %v1591_v42 = vadd.f32 %v1590_v46, %v1589_v59  ;;  %v1596_v28 = vadd.f32 %v1452_v10, %v1436_v40  ;;  %v1675_v37 = vsel %vm1662_vm10, %v1568_v39, %v1655_v41  ;;  %v2982_v53 = vld [vmem:[#allocation41_spill] sm:$0xff]  ;;  %v2984_v46 = vld [vmem:[#allocation43_spill] sm:$0xff] }
 0x1b6   :  { %v1383_v33 = vpop.f32.mrf.mxu2  ;;  %v1412_v45 = vpop.f32.mrf.mxu3  ;;  %v1605_v1 = vadd.f32 %v1453_v36, %v1437_v31 }
 0x1b7   :  { %v1583_v2 = vrot.slane %v1582_v47, 2  ;;  %v1592_v30 = vrot.slane %v1591_v42, 2  ;;  %v1438_v54 = vmul.f32 %v1383_v33, %v2983_v61  ;;  %v1439_v13 = vmul.f32 %v1412_v45, %v2984_v46 }
 0x1b9   :  { %v1584_v3 = vadd.f32 %v1583_v2, %v1582_v47  ;;  %v1593_v23 = vadd.f32 %v1592_v30, %v1591_v42  ;;  %v2985_v47 = vld [vmem:[#allocation38_spill] sm:$0xff] }
 0x1ba   :  { %v1331_v62 = vpop.f32.mrf.mxu0  ;;  %v1360_v49 = vpop.f32.mrf.mxu1 }
 0x1bb   :  { %v1585_v43 = vrot.slane %v1584_v3, 1  ;;  %v1594_v9 = vrot.slane %v1593_v23, 1  ;;  %v1468_v55 = vmul.f32 %v1331_v62, %v2977_v44  ;;  %v1469_v16 = vmul.f32 %v1360_v49, %v2978_v24 }
 0x1bd   :  { %v1586_v34 = vadd.f32 %v1585_v43, %v1584_v3  ;;  %v1595_v21 = vadd.f32 %v1594_v9, %v1593_v23  ;;  %v1597_v22 = vadd.f32 %v1596_v28, %v1468_v55  ;;  %v1606_v38 = vadd.f32 %v1605_v1, %v1469_v16  ;;  %v2987_v9 = vld [vmem:[#allocation36_spill] sm:$0xff] }
 0x1be   :  { %v1386_v29 = vpop.f32.mrf.mxu2  ;;  %v1415_v52 = vpop.f32.mrf.mxu3 }
 0x1bf   :  { %v1656_v5 = vrot.slane %v1586_v34, 6  ;;  %v1657_v56 = vrot.slane %v1595_v21, 5  ;;  %v1454_v15 = vmul.f32 %v1386_v29, %v2981_v35  ;;  %v1455_v59 = vmul.f32 %v1415_v52, %v2982_v53  ;;  %v2988_v34 = vld [vmem:[#allocation37_spill] sm:$0xff] }
 0x1c1   :  { %v1676_v26 = vsel %vm1664_vm11, %v1656_v5, %v1657_v56  ;;  %v1614_v30 = vadd.f32 %v1454_v15, %v1438_v54  ;;  %v1623_v0 = vadd.f32 %v1455_v59, %v1439_v13 }
 0x1c2   :  { %v1334_v27 = vpop.f32.mrf.mxu0  ;;  %v1363_v8 = vpop.f32.mrf.mxu1  ;;  %v1677_v14 = vsel %vm1666_vm12, %v1675_v37, %v1676_v26 }
 0x1c3   :  { %v1484_v11 = vmul.f32 %v1334_v27, %v2979_v60  ;;  %v1485_v51 = vmul.f32 %v1363_v8, %v2980_v57 }
 0x1c5   :  { %v1598_v63 = vadd.f32 %v1597_v22, %v1484_v11  ;;  %v1607_v17 = vadd.f32 %v1606_v38, %v1485_v51 }
 0x1c6   :  { %v1389_v18 = vpop.f32.mrf.mxu2  ;;  %v1418_v50 = vpop.f32.mrf.mxu3 }
 0x1c7   :  { %v1599_v19 = vrot.slane %v1598_v63, 4  ;;  %v1608_v7 = vrot.slane %v1607_v17, 4  ;;  %v1470_v42 = vmul.f32 %v1389_v18, %v2985_v47  ;;  %v1471_v2 = vmul.f32 %v1418_v50, %v2986_v32 }
 0x1c9   :  { %v1600_v25 = vadd.f32 %v1599_v19, %v1598_v63  ;;  %v1609_v12 = vadd.f32 %v1608_v7, %v1607_v17  ;;  %v1615_v49 = vadd.f32 %v1614_v30, %v1470_v42  ;;  %v1624_v43 = vadd.f32 %v1623_v0, %v1471_v2 }
 0x1cb   :  { %v1601_v3 = vrot.slane %v1600_v25, 2  ;;  %v1610_v23 = vrot.slane %v1609_v12, 2 }
 0x1cd   :  { %v1602_v4 = vadd.f32 %v1601_v3, %v1600_v25  ;;  %v1611_v33 = vadd.f32 %v1610_v23, %v1609_v12 }
 0x1ce   :  { %v1392_v48 = vpop.f32.mrf.mxu2  ;;  %v1421_v62 = vpop.f32.mrf.mxu3 }
 0x1cf   :  { %v1486_v41 = vmul.f32 %v1392_v48, %v2987_v9  ;;  %v1487_v21 = vmul.f32 %v1421_v62, %v2988_v34  ;;  %v1603_v39 = vrot.slane %v1602_v4, 1  ;;  %v1612_v58 = vrot.slane %v1611_v33, 1 }
 0x1d1   :  { %v1616_v10 = vadd.f32 %v1615_v49, %v1486_v41  ;;  %v1625_v45 = vadd.f32 %v1624_v43, %v1487_v21  ;;  %v1604_v52 = vadd.f32 %v1603_v39, %v1602_v4  ;;  %v1613_v5 = vadd.f32 %v1612_v58, %v1611_v33 }
 0x1d3   :  { %v1617_v6 = vrot.slane %v1616_v10, 4  ;;  %v1626_v36 = vrot.slane %v1625_v45, 4  ;;  %v1658_v16 = vrot.slane %v1604_v52, 4  ;;  %v1659_v28 = vrot.slane %v1613_v5, 3 }
 0x1d5   :  { %v1618_v40 = vadd.f32 %v1617_v6, %v1616_v10  ;;  %v1627_v20 = vadd.f32 %v1626_v36, %v1625_v45  ;;  %v1678_v8 = vsel %vm1668_vm13, %v1658_v16, %v1659_v28 }
 0x1d7   :  { %v1619_v31 = vrot.slane %v1618_v40, 2  ;;  %v1628_v29 = vrot.slane %v1627_v20, 2 }
 0x1d9   :  { %v1620_v56 = vadd.f32 %v1619_v31, %v1618_v40  ;;  %v1629_v44 = vadd.f32 %v1628_v29, %v1627_v20 }
 0x1db   :  { %v1621_v55 = vrot.slane %v1620_v56, 1  ;;  %v1630_v24 = vrot.slane %v1629_v44, 1 }
 0x1dd   :  { %v1622_v1 = vadd.f32 %v1621_v55, %v1620_v56  ;;  %v1631_v37 = vadd.f32 %v1630_v24, %v1629_v44 }
 0x1df   :  { %v1660_v26 = vrot.slane %v1622_v1, 2  ;;  %v1661_v27 = vrot.slane %v1631_v37, 1 }
 0x1e1   :  { %v1679_v22 = vsel %vm1670_vm14, %v1660_v26, %v1661_v27 }
 0x1e2   :  { %v1680_v38 = vsel %vm1672_vm15, %v1678_v8, %v1679_v22 }
 0x1e3   :  { %v1681_v60 = vsel %vm218_vm0, %v1677_v14, %v1680_v38 }
 0x1e4   :  { %1685 = vst [vmem:[#allocation8 + $0x8] sm:$0xff] %v1681_v60 }
 0x1e5   :  { %1696 = dma.vmem_to_hbm [thread:$0]  %s1692_s14, 256, %s1694_s17, [#allocation4]  }
 0x1e6   :  { %1958 = dma.done.wait [#allocation4], 256  }
 0x1e7   :  { %1959 = vsyncadd [#allocation4], 4294967040 }
 0x1e8   :  { %1701 = vsyncpa [#allocation3], 1 }
 0x1e9   :  { %1702 = vsyncpa [#allocation6], 1 }
 0x1ea   :  { %1703 = vsyncpa [#allocation4], 1 }

</bundles_post_ra>
